<compile_context>
chip_gen: v5e
topology: v5e:2x2
jax: 0.10.0
libtpu: 0.0.40
codegen_flags: <defaults>
</compile_context>

<pallas_src>
import functools

import jax
import jax.numpy as jnp
import numpy as np
from jax.experimental import pallas as pl
from jax.experimental.pallas import tpu as pltpu

BN_EPS = 1e-5
LANE = 128


def _round_up(x, m):
    return (x + m - 1) // m * m


# ---------------------------------------------------------------------------
# Phase 1 kernel: tiled GEMM (folded conv1+conv2) + BN statistics accumulation.
#   cols_ref : (TM, KC)     bf16 im2col tile
#   w_ref    : (KC, CP)     bf16 folded weight (lane-padded)
#   h_ref    : (TM, CP)     f32 pre-BN activation tile (output)
#   stats_ref: (2,  CP)     f32 [sum; sum of squares], revisited across tiles
# ---------------------------------------------------------------------------
def _gemm_stats_kernel(cols_ref, w_ref, h_ref, stats_ref):
    @pl.when(pl.program_id(0) == 0)
    def _():
        stats_ref[...] = jnp.zeros_like(stats_ref)

    h = jnp.dot(cols_ref[...], w_ref[...],
                preferred_element_type=jnp.float32)
    h_ref[...] = h
    # One-pass stats: accumulate sum and sum(x^2); var = E[x^2] - mean^2 later.
    stats_ref[0:1, :] += jnp.sum(h, axis=0, keepdims=True)
    stats_ref[1:2, :] += jnp.sum(h * h, axis=0, keepdims=True)


# ---------------------------------------------------------------------------
# Phase 2 kernel: apply BatchNorm with the GLOBAL statistics + ReLU, streaming.
# All pointwise math kept in f32 (v5e has no bf16 VPU path).
# ---------------------------------------------------------------------------
def _bn_relu_kernel(h_ref, stats_ref, gamma_ref, beta_ref, o_ref, *, m_count):
    inv_m = 1.0 / m_count
    mean = stats_ref[0:1, :] * inv_m
    var = jnp.maximum(stats_ref[1:2, :] * inv_m - mean * mean, 0.0)
    scale = gamma_ref[...] * jax.lax.rsqrt(var + BN_EPS)
    shift = beta_ref[...] - mean * scale
    o_ref[...] = jnp.maximum(h_ref[...] * scale + shift,
                             0.0).astype(o_ref.dtype)


# ---------------------------------------------------------------------------
# Wrapper glue (layout only): im2col, padding, reshapes, transposes.
# ---------------------------------------------------------------------------
def _im2col(x, kd, kh, kw):
    """x: (N, D, H, W, C) -> (N*Do*Ho*Wo, kd*kh*kw*C), valid conv, stride 1."""
    N, D, H, W, C = x.shape
    Do, Ho, Wo = D - kd + 1, H - kh + 1, W - kw + 1
    M = N * Do * Ho * Wo
    cols = []
    for dz in range(kd):
        for dy in range(kh):
            for dx in range(kw):
                cols.append(
                    x[:, dz:dz + Do, dy:dy + Ho, dx:dx + Wo, :].reshape(M, C))
    return jnp.concatenate(cols, axis=1), (Do, Ho, Wo)


def movinet_layer(x, layer_params, *, tile_m=512):
    """One make_layer() block.  x: (N, D, H, W, Cin) -> (N, Do, Ho, Wo, expand)."""
    w1, b1, w2, b2, gamma, beta = layer_params
    kd, kh, kw, cin, base = w1.shape
    expand = w2.shape[-1]
    N = x.shape[0]
    assert x.shape[-1] == cin

    # TODO(synk): the (kd,kh,kw) patch extraction (im2col) is still materialized
    # in the wrapper; folding it into the kernel's tile loads (and fusing the
    # two layers to keep the intermediate on-chip) is the remaining step.
    cols, (Do, Ho, Wo) = _im2col(x.astype(jnp.bfloat16), kd, kh, kw)
    M = N * Do * Ho * Wo
    kc = kd * kh * kw * cin

    # Fold conv1 + 1x1x1 conv2 into one GEMM:  W = w1_flat @ w2 (exact algebra).
    # The folded per-channel bias (b1 @ w2 + b2) is a constant shift removed
    # exactly by the training-mode BatchNorm that follows -> dropped.
    w_fold = jnp.dot(w1.reshape(kc, base), w2)  # (kc, expand), f32

    # Lane-dense channel padding: full 128-wide stores, dense MXU columns.
    c_pad = _round_up(expand, LANE)
    w_fold = jnp.pad(w_fold, ((0, 0), (0, c_pad - expand))).astype(jnp.bfloat16)
    gamma_p = jnp.pad(gamma, (0, c_pad - expand)).reshape(1, c_pad)
    beta_p = jnp.pad(beta, (0, c_pad - expand)).reshape(1, c_pad)

    # Row tiling; pad M with zero rows (zero rows contribute nothing to the
    # bias-free GEMM output nor to the sum / sum-of-squares accumulators).
    tm = tile_m if M >= tile_m else _round_up(M, 8)
    m_pad = _round_up(M, tm)
    if m_pad != M:
        cols = jnp.pad(cols, ((0, m_pad - M), (0, 0)))
    n_tiles = m_pad // tm

    # --- Phase 1: tiled GEMM + global BN statistics (reduction over M). ------
    h, stats = pl.pallas_call(
        _gemm_stats_kernel,
        out_shape=(jax.ShapeDtypeStruct((m_pad, c_pad), jnp.float32),
                   jax.ShapeDtypeStruct((2, c_pad), jnp.float32)),
        grid=(n_tiles,),
        in_specs=[pl.BlockSpec((tm, kc), lambda i: (i, 0)),
                  pl.BlockSpec((kc, c_pad), lambda i: (0, 0))],
        out_specs=(pl.BlockSpec((tm, c_pad), lambda i: (i, 0)),
                   pl.BlockSpec((2, c_pad), lambda i: (0, 0))),
        compiler_params=pltpu.CompilerParams(
            dimension_semantics=("arbitrary",)),
    )(cols, w_fold)

    # --- Phase 2: streaming BN-apply (global stats) + ReLU over M tiles. -----
    out2d = pl.pallas_call(
        functools.partial(_bn_relu_kernel, m_count=float(M)),
        out_shape=jax.ShapeDtypeStruct((m_pad, c_pad), jnp.float32),
        grid=(n_tiles,),
        in_specs=[pl.BlockSpec((tm, c_pad), lambda i: (i, 0)),
                  pl.BlockSpec((2, c_pad), lambda i: (0, 0)),
                  pl.BlockSpec((1, c_pad), lambda i: (0, 0)),
                  pl.BlockSpec((1, c_pad), lambda i: (0, 0))],
        out_specs=pl.BlockSpec((tm, c_pad), lambda i: (i, 0)),
        compiler_params=pltpu.CompilerParams(
            dimension_semantics=("parallel",)),
    )(h, stats, gamma_p, beta_p)

    return out2d[:M, :expand].reshape(N, Do, Ho, Wo, expand)


def block_forward(x_ncdhw, params_list):
    """Full Block.forward.  x_ncdhw: (N, C, D, H, W) -> (N, C_out, D', H', W')."""
    x = jnp.transpose(x_ncdhw, (0, 2, 3, 4, 1))  # -> NDHWC
    for p in params_list:
        x = movinet_layer(x, p)
    return jnp.transpose(x, (0, 4, 1, 2, 3))  # -> NCDHW


# ---------------------------------------------------------------------------
# Deterministic parameter init (shapes follow Block.__init__ / make_layer).
# Conv weights stored channels-last: (kd, kh, kw, Cin, Cout) == PyTorch
# (Cout, Cin, kd, kh, kw) transposed.
# ---------------------------------------------------------------------------
def init_block_params(key, in_channels, kernels, bases, expands):
    params = []
    cin = in_channels
    for kernel, base, expand in zip(kernels, bases, expands):
        kd, kh, kw = kernel
        key, k1, k2, k3, k4, k5, k6 = jax.random.split(key, 7)
        w1 = 0.2 * jax.random.normal(k1, (kd, kh, kw, cin, base), jnp.float32)
        b1 = 0.1 * jax.random.normal(k2, (base,), jnp.float32)
        w2 = 0.2 * jax.random.normal(k3, (base, expand), jnp.float32)
        b2 = 0.1 * jax.random.normal(k4, (expand,), jnp.float32)
        gamma = 1.0 + 0.1 * jax.random.normal(k5, (expand,), jnp.float32)
        beta = 0.1 * jax.random.normal(k6, (expand,), jnp.float32)
        params.append((w1, b1, w2, b2, gamma, beta))
        cin = expand  # next layer's in_channels = previous expand (as in Block)
    return params


# ---------------------------------------------------------------------------
# Plain-JAX reference (same math as PyTorch, with biases, f32 throughout).
# ---------------------------------------------------------------------------
def _ref_layer(x, p, kernel):
    w1, b1, w2, b2, gamma, beta = p
    kd, kh, kw = kernel
    N, D, H, W, C = x.shape
    Do, Ho, Wo = D - kd + 1, H - kh + 1, W - kw + 1
    acc = jnp.zeros((N, Do, Ho, Wo, w1.shape[-1]), jnp.float32)
    for dz in range(kd):
        for dy in range(kh):
            for dx in range(kw):
                patch = x[:, dz:dz + Do, dy:dy + Ho, dx:dx + Wo, :]
                acc = acc + jnp.einsum('ndhwc,co->ndhwo', patch, w1[dz, dy, dx])
    acc = acc + b1
    h = jnp.einsum('ndhwc,co->ndhwo', acc, w2) + b2
    mean = jnp.mean(h, axis=(0, 1, 2, 3), keepdims=True)
    var = jnp.mean(jnp.square(h - mean), axis=(0, 1, 2, 3), keepdims=True)
    h = (h - mean) * jax.lax.rsqrt(var + BN_EPS) * gamma + beta
    return jnp.maximum(h, 0.0)


def _ref_block(x_ncdhw, params_list, kernels):
    x = jnp.transpose(x_ncdhw, (0, 2, 3, 4, 1))
    for p, k in zip(params_list, kernels):
        x = _ref_layer(x, p, k)
    return jnp.transpose(x, (0, 4, 1, 2, 3))


if __name__ == "__main__":
    # Block(in_channels=4, kernels=[(1,3,3),(3,1,1)], bases=[8,8], expands=[8,16])
    in_channels = 4
    kernels = [(1, 3, 3), (3, 1, 1)]
    bases = [8, 8]
    expands = [8, 16]

    key = jax.random.PRNGKey(0)
    key, pkey, xkey = jax.random.split(key, 3)
    params = init_block_params(pkey, in_channels, kernels, bases, expands)

    # PyTorch-style NCDHW input: (N=2, C=4, D=4, H=8, W=8)
    x = jax.random.normal(xkey, (2, in_channels, 4, 8, 8), jnp.float32)

    fwd = jax.jit(lambda inp: block_forward(inp, params))
    out = jax.block_until_ready(fwd(x))

    # shape check: layer1 (1,3,3) valid -> (2,8,4,6,6); layer2 (3,1,1) -> (2,16,2,6,6)
    assert out.shape == (2, expands[-1], 2, 6, 6), out.shape

    ref = jax.block_until_ready(_ref_block(x, params, kernels))
    # bf16 MXU inputs (f32 accumulation) -> small rounding differences vs the
    # f32 reference; both exact-algebra rewrites (weight folding, bias drop,
    # var = E[x^2]-mean^2) are otherwise identical.
    np.testing.assert_allclose(np.asarray(out), np.asarray(ref),
                               rtol=2e-2, atol=2e-2)

    print("KERNEL_OK")
</pallas_src>

<mosaic_0001>
module attributes {stable_mosaic.version = 11 : i64} {
  func.func @_bn_relu_kernel(%arg0: i32, %arg1: memref<288x128xf32, #tpu.memory_space<vmem>>, %arg2: memref<2x128xf32, #tpu.memory_space<vmem>>, %arg3: memref<1x128xf32, #tpu.memory_space<vmem>>, %arg4: memref<1x128xf32, #tpu.memory_space<vmem>>, %arg5: memref<288x128xf32, #tpu.memory_space<vmem>>) attributes {dimension_semantics = [#tpu.dimension_semantics<parallel>], iteration_bounds = array<i64: 1>, scalar_prefetch = 0 : i64, scratch_operands = 0 : i64, tpu.core_type = #tpu.core_type<tc>, window_params = [{transform_indices = @transform_0, window_bounds = array<i64: 288, 128>}, {pipeline_mode = #tpu.pipeline_mode<synchronous>, transform_indices = @transform_1, window_bounds = array<i64: 2, 128>}, {pipeline_mode = #tpu.pipeline_mode<synchronous>, transform_indices = @transform_2, window_bounds = array<i64: 1, 128>}, {pipeline_mode = #tpu.pipeline_mode<synchronous>, transform_indices = @transform_3, window_bounds = array<i64: 1, 128>}, {transform_indices = @transform_4, window_bounds = array<i64: 288, 128>}]} {
    %c0 = arith.constant 0 : index
    %c0_0 = arith.constant 0 : index
    %0 = vector.load %arg2[%c0, %c0_0] : memref<2x128xf32, #tpu.memory_space<vmem>>, vector<1x128xf32>
    %cst = arith.constant 0.00347222225 : f32
    %1 = vector.broadcast %cst : f32 to vector<1x128xf32>
    %2 = arith.mulf %0, %1 : vector<1x128xf32>
    %c1 = arith.constant 1 : index
    %c0_1 = arith.constant 0 : index
    %3 = vector.load %arg2[%c1, %c0_1] : memref<2x128xf32, #tpu.memory_space<vmem>>, vector<1x128xf32>
    %cst_2 = arith.constant 0.00347222225 : f32
    %4 = vector.broadcast %cst_2 : f32 to vector<1x128xf32>
    %5 = arith.mulf %3, %4 : vector<1x128xf32>
    %6 = arith.mulf %2, %2 : vector<1x128xf32>
    %7 = arith.subf %5, %6 : vector<1x128xf32>
    %cst_3 = arith.constant 0.000000e+00 : f32
    %8 = vector.broadcast %cst_3 : f32 to vector<1x128xf32>
    %9 = arith.maximumf %7, %8 : vector<1x128xf32>
    %c0_4 = arith.constant 0 : index
    %c0_5 = arith.constant 0 : index
    %10 = vector.load %arg3[%c0_4, %c0_5] : memref<1x128xf32, #tpu.memory_space<vmem>>, vector<1x128xf32>
    %cst_6 = arith.constant 9.99999974E-6 : f32
    %11 = vector.broadcast %cst_6 : f32 to vector<1x128xf32>
    %12 = arith.addf %9, %11 : vector<1x128xf32>
    %13 = math.rsqrt %12 : vector<1x128xf32>
    %14 = arith.mulf %10, %13 : vector<1x128xf32>
    %c0_7 = arith.constant 0 : index
    %c0_8 = arith.constant 0 : index
    %15 = vector.load %arg4[%c0_7, %c0_8] : memref<1x128xf32, #tpu.memory_space<vmem>>, vector<1x128xf32>
    %16 = arith.mulf %2, %14 : vector<1x128xf32>
    %17 = arith.subf %15, %16 : vector<1x128xf32>
    %c0_9 = arith.constant 0 : index
    %c0_10 = arith.constant 0 : index
    %18 = vector.load %arg1[%c0_9, %c0_10] : memref<288x128xf32, #tpu.memory_space<vmem>>, vector<288x128xf32>
    %19 = vector.broadcast %14 : vector<1x128xf32> to vector<288x128xf32>
    %20 = arith.mulf %18, %19 : vector<288x128xf32>
    %21 = vector.broadcast %17 : vector<1x128xf32> to vector<288x128xf32>
    %22 = arith.addf %20, %21 : vector<288x128xf32>
    %cst_11 = arith.constant 0.000000e+00 : f32
    %23 = vector.broadcast %cst_11 : f32 to vector<288x128xf32>
    %24 = arith.maximumf %22, %23 : vector<288x128xf32>
    %c0_12 = arith.constant 0 : index
    %c0_13 = arith.constant 0 : index
    %25 = vector.load %arg5[%c0_12, %c0_13] : memref<288x128xf32, #tpu.memory_space<vmem>>, vector<288x128xf32>
    tpu.vector_store %arg5[%c0_12, %c0_13], %24 {strides = array<i32>} : memref<288x128xf32, #tpu.memory_space<vmem>>, vector<288x128xf32>,
    return
  }
  func.func @transform_0(%arg0: i32) -> (i32, i32) {
    %c0_i32 = arith.constant 0 : i32
    %c0_i32_0 = arith.constant 0 : i32
    return %arg0, %c0_i32 : i32, i32
  }
  func.func @transform_1(%arg0: i32) -> (i32, i32) {
    %c0_i32 = arith.constant 0 : i32
    %c0_i32_0 = arith.constant 0 : i32
    %c0_i32_1 = arith.constant 0 : i32
    return %c0_i32, %c0_i32_0 : i32, i32
  }
  func.func @transform_2(%arg0: i32) -> (i32, i32) {
    %c0_i32 = arith.constant 0 : i32
    %c0_i32_0 = arith.constant 0 : i32
    %c0_i32_1 = arith.constant 0 : i32
    return %c0_i32, %c0_i32_0 : i32, i32
  }
  func.func @transform_3(%arg0: i32) -> (i32, i32) {
    %c0_i32 = arith.constant 0 : i32
    %c0_i32_0 = arith.constant 0 : i32
    %c0_i32_1 = arith.constant 0 : i32
    return %c0_i32, %c0_i32_0 : i32, i32
  }
  func.func @transform_4(%arg0: i32) -> (i32, i32) {
    %c0_i32 = arith.constant 0 : i32
    %c0_i32_0 = arith.constant 0 : i32
    return %arg0, %c0_i32 : i32, i32
  }
}

module attributes {stable_mosaic.version = 11 : i64} {
  func.func @_gemm_stats_kernel(%arg0: i32, %arg1: memref<288x36xbf16, #tpu.memory_space<vmem>>, %arg2: memref<36x128xbf16, #tpu.memory_space<vmem>>, %arg3: memref<288x128xf32, #tpu.memory_space<vmem>>, %arg4: memref<2x128xf32, #tpu.memory_space<vmem>>) attributes {dimension_semantics = [#tpu.dimension_semantics<arbitrary>], iteration_bounds = array<i64: 1>, scalar_prefetch = 0 : i64, scratch_operands = 0 : i64, tpu.core_type = #tpu.core_type<tc>, window_params = [{transform_indices = @transform_0, window_bounds = array<i64: 288, 36>}, {pipeline_mode = #tpu.pipeline_mode<synchronous>, transform_indices = @transform_1, window_bounds = array<i64: 36, 128>}, {transform_indices = @transform_2, window_bounds = array<i64: 288, 128>}, {pipeline_mode = #tpu.pipeline_mode<synchronous>, transform_indices = @transform_3, window_bounds = array<i64: 2, 128>}]} {
    %c0_i32 = arith.constant 0 : i32
    %0 = arith.cmpi eq, %arg0, %c0_i32 : i32
    %1 = arith.extui %0 : i1 to i32
    %c0_i32_0 = arith.constant 0 : i32
    %2 = arith.cmpi ne, %1, %c0_i32_0 : i32
    scf.if %2 {
      %cst_15 = arith.constant 0.000000e+00 : f32
      %18 = vector.broadcast %cst_15 : f32 to vector<2x128xf32>
      %c0_16 = arith.constant 0 : index
      %c0_17 = arith.constant 0 : index
      %19 = vector.load %arg4[%c0_16, %c0_17] : memref<2x128xf32, #tpu.memory_space<vmem>>, vector<2x128xf32>
      tpu.vector_store %arg4[%c0_16, %c0_17], %18 {strides = array<i32>} : memref<2x128xf32, #tpu.memory_space<vmem>>, vector<2x128xf32>,
    } else {
    }
    %c0 = arith.constant 0 : index
    %c0_1 = arith.constant 0 : index
    %3 = vector.load %arg1[%c0, %c0_1] : memref<288x36xbf16, #tpu.memory_space<vmem>>, vector<288x36xbf16>
    %c0_2 = arith.constant 0 : index
    %c0_3 = arith.constant 0 : index
    %4 = vector.load %arg2[%c0_2, %c0_3] : memref<36x128xbf16, #tpu.memory_space<vmem>>, vector<36x128xbf16>
    %cst = arith.constant dense<0.000000e+00> : vector<288x128xf32>
    %5 = tpu.matmul %3, %4, %cst {dimension_numbers = #tpu.dot_dimension_numbers<[1], [0], [0], [1], [0, 0, 1, 1], [], []>} : vector<288x36xbf16>, vector<36x128xbf16>, vector<288x128xf32> -> vector<288x128xf32>
    %c0_4 = arith.constant 0 : index
    %c0_5 = arith.constant 0 : index
    %6 = vector.load %arg3[%c0_4, %c0_5] : memref<288x128xf32, #tpu.memory_space<vmem>>, vector<288x128xf32>
    tpu.vector_store %arg3[%c0_4, %c0_5], %5 {strides = array<i32>} : memref<288x128xf32, #tpu.memory_space<vmem>>, vector<288x128xf32>,
    %c0_6 = arith.constant 0 : index
    %c0_7 = arith.constant 0 : index
    %7 = vector.load %arg4[%c0_6, %c0_7] : memref<2x128xf32, #tpu.memory_space<vmem>>, vector<1x128xf32>
    %cst_8 = arith.constant dense<0.000000e+00> : vector<128xf32>
    %8 = vector.multi_reduction <add>, %5, %cst_8 [0] : vector<288x128xf32> to vector<128xf32>
    %9 = vector.shape_cast %8 : vector<128xf32> to vector<1x128xf32>
    %10 = arith.addf %7, %9 : vector<1x128xf32>
    %c0_9 = arith.constant 0 : index
    %c0_10 = arith.constant 0 : index
    %11 = vector.load %arg4[%c0_9, %c0_10] : memref<2x128xf32, #tpu.memory_space<vmem>>, vector<1x128xf32>
    tpu.vector_store %arg4[%c0_9, %c0_10], %10 {strides = array<i32>} : memref<2x128xf32, #tpu.memory_space<vmem>>, vector<1x128xf32>,
    %c1 = arith.constant 1 : index
    %c0_11 = arith.constant 0 : index
    %12 = vector.load %arg4[%c1, %c0_11] : memref<2x128xf32, #tpu.memory_space<vmem>>, vector<1x128xf32>
    %13 = arith.mulf %5, %5 : vector<288x128xf32>
    %cst_12 = arith.constant dense<0.000000e+00> : vector<128xf32>
    %14 = vector.multi_reduction <add>, %13, %cst_12 [0] : vector<288x128xf32> to vector<128xf32>
    %15 = vector.shape_cast %14 : vector<128xf32> to vector<1x128xf32>
    %16 = arith.addf %12, %15 : vector<1x128xf32>
    %c1_13 = arith.constant 1 : index
    %c0_14 = arith.constant 0 : index
    %17 = vector.load %arg4[%c1_13, %c0_14] : memref<2x128xf32, #tpu.memory_space<vmem>>, vector<1x128xf32>
    tpu.vector_store %arg4[%c1_13, %c0_14], %16 {strides = array<i32>} : memref<2x128xf32, #tpu.memory_space<vmem>>, vector<1x128xf32>,
    return
  }
  func.func @transform_0(%arg0: i32) -> (i32, i32) {
    %c0_i32 = arith.constant 0 : i32
    %c0_i32_0 = arith.constant 0 : i32
    return %arg0, %c0_i32 : i32, i32
  }
  func.func @transform_1(%arg0: i32) -> (i32, i32) {
    %c0_i32 = arith.constant 0 : i32
    %c0_i32_0 = arith.constant 0 : i32
    %c0_i32_1 = arith.constant 0 : i32
    return %c0_i32, %c0_i32_0 : i32, i32
  }
  func.func @transform_2(%arg0: i32) -> (i32, i32) {
    %c0_i32 = arith.constant 0 : i32
    %c0_i32_0 = arith.constant 0 : i32
    return %arg0, %c0_i32 : i32, i32
  }
  func.func @transform_3(%arg0: i32) -> (i32, i32) {
    %c0_i32 = arith.constant 0 : i32
    %c0_i32_0 = arith.constant 0 : i32
    %c0_i32_1 = arith.constant 0 : i32
    return %c0_i32, %c0_i32_0 : i32, i32
  }
}

module attributes {stable_mosaic.version = 11 : i64} {
  func.func @_gemm_stats_kernel(%arg0: i32, %arg1: memref<144x24xbf16, #tpu.memory_space<vmem>>, %arg2: memref<24x128xbf16, #tpu.memory_space<vmem>>, %arg3: memref<144x128xf32, #tpu.memory_space<vmem>>, %arg4: memref<2x128xf32, #tpu.memory_space<vmem>>) attributes {dimension_semantics = [#tpu.dimension_semantics<arbitrary>], iteration_bounds = array<i64: 1>, scalar_prefetch = 0 : i64, scratch_operands = 0 : i64, tpu.core_type = #tpu.core_type<tc>, window_params = [{transform_indices = @transform_0, window_bounds = array<i64: 144, 24>}, {pipeline_mode = #tpu.pipeline_mode<synchronous>, transform_indices = @transform_1, window_bounds = array<i64: 24, 128>}, {transform_indices = @transform_2, window_bounds = array<i64: 144, 128>}, {pipeline_mode = #tpu.pipeline_mode<synchronous>, transform_indices = @transform_3, window_bounds = array<i64: 2, 128>}]} {
    %c0_i32 = arith.constant 0 : i32
    %0 = arith.cmpi eq, %arg0, %c0_i32 : i32
    %1 = arith.extui %0 : i1 to i32
    %c0_i32_0 = arith.constant 0 : i32
    %2 = arith.cmpi ne, %1, %c0_i32_0 : i32
    scf.if %2 {
      %cst_15 = arith.constant 0.000000e+00 : f32
      %18 = vector.broadcast %cst_15 : f32 to vector<2x128xf32>
      %c0_16 = arith.constant 0 : index
      %c0_17 = arith.constant 0 : index
      %19 = vector.load %arg4[%c0_16, %c0_17] : memref<2x128xf32, #tpu.memory_space<vmem>>, vector<2x128xf32>
      tpu.vector_store %arg4[%c0_16, %c0_17], %18 {strides = array<i32>} : memref<2x128xf32, #tpu.memory_space<vmem>>, vector<2x128xf32>,
    } else {
    }
    %c0 = arith.constant 0 : index
    %c0_1 = arith.constant 0 : index
    %3 = vector.load %arg1[%c0, %c0_1] : memref<144x24xbf16, #tpu.memory_space<vmem>>, vector<144x24xbf16>
    %c0_2 = arith.constant 0 : index
    %c0_3 = arith.constant 0 : index
    %4 = vector.load %arg2[%c0_2, %c0_3] : memref<24x128xbf16, #tpu.memory_space<vmem>>, vector<24x128xbf16>
    %cst = arith.constant dense<0.000000e+00> : vector<144x128xf32>
    %5 = tpu.matmul %3, %4, %cst {dimension_numbers = #tpu.dot_dimension_numbers<[1], [0], [0], [1], [0, 0, 1, 1], [], []>} : vector<144x24xbf16>, vector<24x128xbf16>, vector<144x128xf32> -> vector<144x128xf32>
    %c0_4 = arith.constant 0 : index
    %c0_5 = arith.constant 0 : index
    %6 = vector.load %arg3[%c0_4, %c0_5] : memref<144x128xf32, #tpu.memory_space<vmem>>, vector<144x128xf32>
    tpu.vector_store %arg3[%c0_4, %c0_5], %5 {strides = array<i32>} : memref<144x128xf32, #tpu.memory_space<vmem>>, vector<144x128xf32>,
    %c0_6 = arith.constant 0 : index
    %c0_7 = arith.constant 0 : index
    %7 = vector.load %arg4[%c0_6, %c0_7] : memref<2x128xf32, #tpu.memory_space<vmem>>, vector<1x128xf32>
    %cst_8 = arith.constant dense<0.000000e+00> : vector<128xf32>
    %8 = vector.multi_reduction <add>, %5, %cst_8 [0] : vector<144x128xf32> to vector<128xf32>
    %9 = vector.shape_cast %8 : vector<128xf32> to vector<1x128xf32>
    %10 = arith.addf %7, %9 : vector<1x128xf32>
    %c0_9 = arith.constant 0 : index
    %c0_10 = arith.constant 0 : index
    %11 = vector.load %arg4[%c0_9, %c0_10] : memref<2x128xf32, #tpu.memory_space<vmem>>, vector<1x128xf32>
    tpu.vector_store %arg4[%c0_9, %c0_10], %10 {strides = array<i32>} : memref<2x128xf32, #tpu.memory_space<vmem>>, vector<1x128xf32>,
    %c1 = arith.constant 1 : index
    %c0_11 = arith.constant 0 : index
    %12 = vector.load %arg4[%c1, %c0_11] : memref<2x128xf32, #tpu.memory_space<vmem>>, vector<1x128xf32>
    %13 = arith.mulf %5, %5 : vector<144x128xf32>
    %cst_12 = arith.constant dense<0.000000e+00> : vector<128xf32>
    %14 = vector.multi_reduction <add>, %13, %cst_12 [0] : vector<144x128xf32> to vector<128xf32>
    %15 = vector.shape_cast %14 : vector<128xf32> to vector<1x128xf32>
    %16 = arith.addf %12, %15 : vector<1x128xf32>
    %c1_13 = arith.constant 1 : index
    %c0_14 = arith.constant 0 : index
    %17 = vector.load %arg4[%c1_13, %c0_14] : memref<2x128xf32, #tpu.memory_space<vmem>>, vector<1x128xf32>
    tpu.vector_store %arg4[%c1_13, %c0_14], %16 {strides = array<i32>} : memref<2x128xf32, #tpu.memory_space<vmem>>, vector<1x128xf32>,
    return
  }
  func.func @transform_0(%arg0: i32) -> (i32, i32) {
    %c0_i32 = arith.constant 0 : i32
    %c0_i32_0 = arith.constant 0 : i32
    return %arg0, %c0_i32 : i32, i32
  }
  func.func @transform_1(%arg0: i32) -> (i32, i32) {
    %c0_i32 = arith.constant 0 : i32
    %c0_i32_0 = arith.constant 0 : i32
    %c0_i32_1 = arith.constant 0 : i32
    return %c0_i32, %c0_i32_0 : i32, i32
  }
  func.func @transform_2(%arg0: i32) -> (i32, i32) {
    %c0_i32 = arith.constant 0 : i32
    %c0_i32_0 = arith.constant 0 : i32
    return %arg0, %c0_i32 : i32, i32
  }
  func.func @transform_3(%arg0: i32) -> (i32, i32) {
    %c0_i32 = arith.constant 0 : i32
    %c0_i32_0 = arith.constant 0 : i32
    %c0_i32_1 = arith.constant 0 : i32
    return %c0_i32, %c0_i32_0 : i32, i32
  }
}

module attributes {stable_mosaic.version = 11 : i64} {
  func.func @_bn_relu_kernel(%arg0: i32, %arg1: memref<144x128xf32, #tpu.memory_space<vmem>>, %arg2: memref<2x128xf32, #tpu.memory_space<vmem>>, %arg3: memref<1x128xf32, #tpu.memory_space<vmem>>, %arg4: memref<1x128xf32, #tpu.memory_space<vmem>>, %arg5: memref<144x128xf32, #tpu.memory_space<vmem>>) attributes {dimension_semantics = [#tpu.dimension_semantics<parallel>], iteration_bounds = array<i64: 1>, scalar_prefetch = 0 : i64, scratch_operands = 0 : i64, tpu.core_type = #tpu.core_type<tc>, window_params = [{transform_indices = @transform_0, window_bounds = array<i64: 144, 128>}, {pipeline_mode = #tpu.pipeline_mode<synchronous>, transform_indices = @transform_1, window_bounds = array<i64: 2, 128>}, {pipeline_mode = #tpu.pipeline_mode<synchronous>, transform_indices = @transform_2, window_bounds = array<i64: 1, 128>}, {pipeline_mode = #tpu.pipeline_mode<synchronous>, transform_indices = @transform_3, window_bounds = array<i64: 1, 128>}, {transform_indices = @transform_4, window_bounds = array<i64: 144, 128>}]} {
    %c0 = arith.constant 0 : index
    %c0_0 = arith.constant 0 : index
    %0 = vector.load %arg2[%c0, %c0_0] : memref<2x128xf32, #tpu.memory_space<vmem>>, vector<1x128xf32>
    %cst = arith.constant 0.0069444445 : f32
    %1 = vector.broadcast %cst : f32 to vector<1x128xf32>
    %2 = arith.mulf %0, %1 : vector<1x128xf32>
    %c1 = arith.constant 1 : index
    %c0_1 = arith.constant 0 : index
    %3 = vector.load %arg2[%c1, %c0_1] : memref<2x128xf32, #tpu.memory_space<vmem>>, vector<1x128xf32>
    %cst_2 = arith.constant 0.0069444445 : f32
    %4 = vector.broadcast %cst_2 : f32 to vector<1x128xf32>
    %5 = arith.mulf %3, %4 : vector<1x128xf32>
    %6 = arith.mulf %2, %2 : vector<1x128xf32>
    %7 = arith.subf %5, %6 : vector<1x128xf32>
    %cst_3 = arith.constant 0.000000e+00 : f32
    %8 = vector.broadcast %cst_3 : f32 to vector<1x128xf32>
    %9 = arith.maximumf %7, %8 : vector<1x128xf32>
    %c0_4 = arith.constant 0 : index
    %c0_5 = arith.constant 0 : index
    %10 = vector.load %arg3[%c0_4, %c0_5] : memref<1x128xf32, #tpu.memory_space<vmem>>, vector<1x128xf32>
    %cst_6 = arith.constant 9.99999974E-6 : f32
    %11 = vector.broadcast %cst_6 : f32 to vector<1x128xf32>
    %12 = arith.addf %9, %11 : vector<1x128xf32>
    %13 = math.rsqrt %12 : vector<1x128xf32>
    %14 = arith.mulf %10, %13 : vector<1x128xf32>
    %c0_7 = arith.constant 0 : index
    %c0_8 = arith.constant 0 : index
    %15 = vector.load %arg4[%c0_7, %c0_8] : memref<1x128xf32, #tpu.memory_space<vmem>>, vector<1x128xf32>
    %16 = arith.mulf %2, %14 : vector<1x128xf32>
    %17 = arith.subf %15, %16 : vector<1x128xf32>
    %c0_9 = arith.constant 0 : index
    %c0_10 = arith.constant 0 : index
    %18 = vector.load %arg1[%c0_9, %c0_10] : memref<144x128xf32, #tpu.memory_space<vmem>>, vector<144x128xf32>
    %19 = vector.broadcast %14 : vector<1x128xf32> to vector<144x128xf32>
    %20 = arith.mulf %18, %19 : vector<144x128xf32>
    %21 = vector.broadcast %17 : vector<1x128xf32> to vector<144x128xf32>
    %22 = arith.addf %20, %21 : vector<144x128xf32>
    %cst_11 = arith.constant 0.000000e+00 : f32
    %23 = vector.broadcast %cst_11 : f32 to vector<144x128xf32>
    %24 = arith.maximumf %22, %23 : vector<144x128xf32>
    %c0_12 = arith.constant 0 : index
    %c0_13 = arith.constant 0 : index
    %25 = vector.load %arg5[%c0_12, %c0_13] : memref<144x128xf32, #tpu.memory_space<vmem>>, vector<144x128xf32>
    tpu.vector_store %arg5[%c0_12, %c0_13], %24 {strides = array<i32>} : memref<144x128xf32, #tpu.memory_space<vmem>>, vector<144x128xf32>,
    return
  }
  func.func @transform_0(%arg0: i32) -> (i32, i32) {
    %c0_i32 = arith.constant 0 : i32
    %c0_i32_0 = arith.constant 0 : i32
    return %arg0, %c0_i32 : i32, i32
  }
  func.func @transform_1(%arg0: i32) -> (i32, i32) {
    %c0_i32 = arith.constant 0 : i32
    %c0_i32_0 = arith.constant 0 : i32
    %c0_i32_1 = arith.constant 0 : i32
    return %c0_i32, %c0_i32_0 : i32, i32
  }
  func.func @transform_2(%arg0: i32) -> (i32, i32) {
    %c0_i32 = arith.constant 0 : i32
    %c0_i32_0 = arith.constant 0 : i32
    %c0_i32_1 = arith.constant 0 : i32
    return %c0_i32, %c0_i32_0 : i32, i32
  }
  func.func @transform_3(%arg0: i32) -> (i32, i32) {
    %c0_i32 = arith.constant 0 : i32
    %c0_i32_0 = arith.constant 0 : i32
    %c0_i32_1 = arith.constant 0 : i32
    return %c0_i32, %c0_i32_0 : i32, i32
  }
  func.func @transform_4(%arg0: i32) -> (i32, i32) {
    %c0_i32 = arith.constant 0 : i32
    %c0_i32_0 = arith.constant 0 : i32
    return %arg0, %c0_i32 : i32, i32
  }
}

</mosaic_0001>

<bundles_post_ra>
// kernel: _lambda_.5
= control target key start
LH: loop header
LB: loop body
LE: loop exit
PB: predicated region body
PF: predicated region fallthrough
CT: control target
= control target key end

     0   :  { %s561_s1 = inlined_call_operand.vmem [shape: f32[2,128], index: 1, kind: input, shape index: {}]   ;;  %s562_s2 = inlined_call_operand.vmem [shape: f32[1,128], index: 2, kind: input, shape index: {}]   ;;  %s563_s3 = inlined_call_operand.vmem [shape: f32[1,128], index: 3, kind: input, shape index: {}]   ;;  %s564_s0 = inlined_call_operand.vmem [shape: f32[288,128], index: 0, kind: input, shape index: {}]   ;;  %s565_s4 = inlined_call_operand.vmem [shape: f32[288,128], index: 4, kind: output, shape index: {}]  }
   0x1   :  { %v17_v0 = vld [vmem:[%s561_s1] sm:$0x1]  ;;  %v19_v1 = vld [vmem:[%s561_s1 + $0x1] sm:$0x1]  ;;  %v41_v19 = vld [vmem:[%s564_s0 + $0x8] sm:$0xff] }
   0x2   :  { %v18_v2 = vmul.f32 0.0034722222, %v17_v0  ;;  %v20_v3 = vmul.f32 0.0034722222, %v19_v1  ;;  %v24_v13 = vld [vmem:[%s562_s2] sm:$0x1] }
   0x3   :  { %v37_v17 = vld [vmem:[%s563_s3] sm:$0x1]  ;;  %v42_v20 = vld [vmem:[%s564_s0 + $0x10] sm:$0xff]  ;;  %v43_v23 = vld [vmem:[%s564_s0 + $0x18] sm:$0xff] }
   0x4   :  { %v21_v4 = vmul.f32 %v18_v2, %v18_v2  ;;  %v40_v18 = vld [vmem:[%s564_s0] sm:$0xff]  ;;  %v45_v25 = vld [vmem:[%s564_s0 + $0x28] sm:$0xff]  ;;  %v46_v26 = vld [vmem:[%s564_s0 + $0x30] sm:$0xff] }
   0x5   :  { %v44_v24 = vld [vmem:[%s564_s0 + $0x20] sm:$0xff]  ;;  %v47_v31 = vld [vmem:[%s564_s0 + $0x38] sm:$0xff]  ;;  %v49_v38 = vld [vmem:[%s564_s0 + $0x48] sm:$0xff] }
   0x6   :  { %v22_v5 = vsub.f32 %v20_v3, %v21_v4  ;;  %v48_v32 = vld [vmem:[%s564_s0 + $0x40] sm:$0xff]  ;;  %v50_v39 = vld [vmem:[%s564_s0 + $0x50] sm:$0xff]  ;;  %v51_v46 = vld [vmem:[%s564_s0 + $0x58] sm:$0xff] }
   0x7   :  { %v52_v51 = vld [vmem:[%s564_s0 + $0x60] sm:$0xff]  ;;  %v53_v56 = vld [vmem:[%s564_s0 + $0x68] sm:$0xff]  ;;  %v54_v60 = vld [vmem:[%s564_s0 + $0x70] sm:$0xff] }
   0x8   :  { %v23_v6 = vmax.f32 %v22_v5, 0.0  ;;  %v55_v0 = vld [vmem:[%s564_s0 + $0x78] sm:$0xff]  ;;  %v56_v4 = vld [vmem:[%s564_s0 + $0x80] sm:$0xff] }
   0xa   :  { %v25_v7 = vadd.f32 1e-05, %v23_v6 }
   0xc   :  { %230 = vrsqrt.f32 %v25_v7  ;;  %vm32_vm0 = vweird.f32 %v25_v7 }
  0x12   :  { %v231_v8 = vpop.eup %230 }
  0x13   :  { %v27_v9 = vmul.f32 %v231_v8, %v25_v7  ;;  %vm33_vm1 = vweird.f32 %v231_v8 }
  0x14   :  { %vm34_vm2 = vmor %vm32_vm0, %vm33_vm1 }
  0x15   :  { %v28_v10 = vmul.f32 %v231_v8, %v27_v9 }
  0x17   :  { %v29_v11 = vmul.f32 0.5, %v28_v10 }
  0x19   :  { %v30_v12 = vsub.f32 1.5, %v29_v11 }
  0x1b   :  { %v31_v14 = vmul.f32 %v231_v8, %v30_v12  ;;  %v58_v12 = vld [vmem:[%s564_s0 + $0x90] sm:$0xff] }
  0x1d   :  { %v35_v15 = vsel %vm34_vm2, %v231_v8, %v31_v14  ;;  %v57_v8 = vld [vmem:[%s564_s0 + $0x88] sm:$0xff] }
  0x1e   :  { %v36_v16 = vmul.f32 %v35_v15, %v24_v13 }
  0x20   :  { %v38_v21 = vmul.f32 %v36_v16, %v18_v2  ;;  %v278_v22 = vperm.slane %v36_v16, 0  ;;  %v59_v16 = vld [vmem:[%s564_s0 + $0x98] sm:$0xff] }
  0x22   :  { %v39_v27 = vsub.f32 %v37_v17, %v38_v21  ;;  %v79_v28 = vmul.f32 %v278_v22, %v40_v18  ;;  %v80_v29 = vmul.f32 %v278_v22, %v41_v19  ;;  %v81_v30 = vmul.f32 %v278_v22, %v42_v20  ;;  %v60_v20 = vld [vmem:[%s564_s0 + $0xa0] sm:$0xff] }
  0x23   :  { %v82_v33 = vmul.f32 %v278_v22, %v43_v23  ;;  %v83_v34 = vmul.f32 %v278_v22, %v44_v24  ;;  %v84_v35 = vmul.f32 %v278_v22, %v45_v25  ;;  %v85_v37 = vmul.f32 %v278_v22, %v46_v26  ;;  %v61_v25 = vld [vmem:[%s564_s0 + $0xa8] sm:$0xff] }
  0x24   :  { %v304_v36 = vperm.slane %v39_v27, 0  ;;  %v86_v40 = vmul.f32 %v278_v22, %v47_v31  ;;  %v87_v41 = vmul.f32 %v278_v22, %v48_v32  ;;  %v88_v49 = vmul.f32 %v278_v22, %v49_v38  ;;  %v64_v38 = vld [vmem:[%s564_s0 + $0xc0] sm:$0xff] }
  0x25   :  { %v89_v50 = vmul.f32 %v278_v22, %v50_v39  ;;  %v90_v59 = vmul.f32 %v278_v22, %v51_v46  ;;  %v91_v63 = vmul.f32 %v278_v22, %v52_v51  ;;  %v92_v3 = vmul.f32 %v278_v22, %v53_v56  ;;  %v66_v46 = vld [vmem:[%s564_s0 + $0xd0] sm:$0xff] }
  0x26   :  { %v118_v42 = vadd.f32 %v304_v36, %v79_v28  ;;  %v119_v43 = vadd.f32 %v304_v36, %v80_v29  ;;  %v120_v44 = vadd.f32 %v304_v36, %v81_v30  ;;  %v121_v45 = vadd.f32 %v304_v36, %v82_v33  ;;  %v62_v29 = vld [vmem:[%s564_s0 + $0xb0] sm:$0xff]  ;;  %v63_v33 = vld [vmem:[%s564_s0 + $0xb8] sm:$0xff] }
  0x27   :  { %v122_v47 = vadd.f32 %v304_v36, %v83_v34  ;;  %v123_v48 = vadd.f32 %v304_v36, %v84_v35  ;;  %v124_v55 = vadd.f32 %v304_v36, %v85_v37  ;;  %v125_v58 = vadd.f32 %v304_v36, %v86_v40 }
  0x28   :  { %v154_v52 = vmax.f32 %v118_v42, 0.0  ;;  %v155_v53 = vmax.f32 %v119_v43, 0.0  ;;  %v156_v54 = vmax.f32 %v120_v44, 0.0  ;;  %v157_v57 = vmax.f32 %v121_v45, 0.0  ;;  %v65_v42 = vld [vmem:[%s564_s0 + $0xc8] sm:$0xff] }
  0x29   :  { %v158_v61 = vmax.f32 %v122_v47, 0.0  ;;  %v126_v62 = vadd.f32 %v304_v36, %v87_v41  ;;  %v159_v1 = vmax.f32 %v123_v48, 0.0  ;;  %v127_v2 = vadd.f32 %v304_v36, %v88_v49 }
  0x2a   :  { %190 = vst [vmem:[%s565_s4] sm:$0xff] %v154_v52  ;;  %v160_v5 = vmax.f32 %v124_v55, 0.0  ;;  %v128_v6 = vadd.f32 %v304_v36, %v89_v50  ;;  %v93_v7 = vmul.f32 %v278_v22, %v54_v60  ;;  %v161_v9 = vmax.f32 %v125_v58, 0.0  ;;  %v67_v50 = vld [vmem:[%s564_s0 + $0xd8] sm:$0xff]  ;;  %v69_v58 = vld [vmem:[%s564_s0 + $0xe8] sm:$0xff] }
  0x2b   :  { %191 = vst [vmem:[%s565_s4 + $0x8] sm:$0xff] %v155_v53  ;;  %v129_v10 = vadd.f32 %v304_v36, %v90_v59  ;;  %v94_v11 = vmul.f32 %v278_v22, %v55_v0  ;;  %v162_v13 = vmax.f32 %v126_v62, 0.0  ;;  %v130_v14 = vadd.f32 %v304_v36, %v91_v63  ;;  %v70_v62 = vld [vmem:[%s564_s0 + $0xf0] sm:$0xff] }
  0x2c   :  { %192 = vst [vmem:[%s565_s4 + $0x10] sm:$0xff] %v156_v54  ;;  %v95_v15 = vmul.f32 %v278_v22, %v56_v4  ;;  %v163_v17 = vmax.f32 %v127_v2, 0.0  ;;  %v131_v18 = vadd.f32 %v304_v36, %v92_v3  ;;  %v96_v19 = vmul.f32 %v278_v22, %v57_v8  ;;  %v68_v54 = vld [vmem:[%s564_s0 + $0xe0] sm:$0xff]  ;;  %v71_v2 = vld [vmem:[%s564_s0 + $0xf8] sm:$0xff] }
  0x2d   :  { %193 = vst [vmem:[%s565_s4 + $0x18] sm:$0xff] %v157_v57  ;;  %v164_v21 = vmax.f32 %v128_v6, 0.0  ;;  %v132_v23 = vadd.f32 %v304_v36, %v93_v7  ;;  %v97_v24 = vmul.f32 %v278_v22, %v58_v12  ;;  %v165_v26 = vmax.f32 %v129_v10, 0.0  ;;  %v72_v6 = vld [vmem:[%s564_s0 + $0x100] sm:$0xff]  ;;  %v73_v10 = vld [vmem:[%s564_s0 + $0x108] sm:$0xff] }
  0x2e   :  { %194 = vst [vmem:[%s565_s4 + $0x20] sm:$0xff] %v158_v61  ;;  %v133_v27 = vadd.f32 %v304_v36, %v94_v11  ;;  %v98_v28 = vmul.f32 %v278_v22, %v59_v16  ;;  %v166_v30 = vmax.f32 %v130_v14, 0.0  ;;  %v134_v31 = vadd.f32 %v304_v36, %v95_v15  ;;  %v74_v14 = vld [vmem:[%s564_s0 + $0x110] sm:$0xff] }
  0x2f   :  { %195 = vst [vmem:[%s565_s4 + $0x28] sm:$0xff] %v159_v1  ;;  %v99_v32 = vmul.f32 %v278_v22, %v60_v20  ;;  %v167_v34 = vmax.f32 %v131_v18, 0.0  ;;  %v135_v35 = vadd.f32 %v304_v36, %v96_v19  ;;  %v100_v37 = vmul.f32 %v278_v22, %v61_v25  ;;  %v75_v18 = vld [vmem:[%s564_s0 + $0x118] sm:$0xff] }
  0x30   :  { %196 = vst [vmem:[%s565_s4 + $0x30] sm:$0xff] %v160_v5  ;;  %v168_v39 = vmax.f32 %v132_v23, 0.0  ;;  %v136_v40 = vadd.f32 %v304_v36, %v97_v24  ;;  %v101_v41 = vmul.f32 %v278_v22, %v62_v29  ;;  %v169_v43 = vmax.f32 %v133_v27, 0.0 }
  0x31   :  { %197 = vst [vmem:[%s565_s4 + $0x38] sm:$0xff] %v161_v9  ;;  %v137_v44 = vadd.f32 %v304_v36, %v98_v28  ;;  %v102_v45 = vmul.f32 %v278_v22, %v63_v33  ;;  %v170_v47 = vmax.f32 %v134_v31, 0.0  ;;  %v138_v48 = vadd.f32 %v304_v36, %v99_v32 }
  0x32   :  { %198 = vst [vmem:[%s565_s4 + $0x40] sm:$0xff] %v162_v13  ;;  %v103_v49 = vmul.f32 %v278_v22, %v64_v38  ;;  %v171_v51 = vmax.f32 %v135_v35, 0.0  ;;  %v139_v52 = vadd.f32 %v304_v36, %v100_v37  ;;  %v104_v53 = vmul.f32 %v278_v22, %v65_v42 }
  0x33   :  { %199 = vst [vmem:[%s565_s4 + $0x48] sm:$0xff] %v163_v17  ;;  %v172_v55 = vmax.f32 %v136_v40, 0.0  ;;  %v140_v56 = vadd.f32 %v304_v36, %v101_v41  ;;  %v105_v57 = vmul.f32 %v278_v22, %v66_v46  ;;  %v173_v59 = vmax.f32 %v137_v44, 0.0 }
  0x34   :  { %200 = vst [vmem:[%s565_s4 + $0x50] sm:$0xff] %v164_v21  ;;  %v141_v60 = vadd.f32 %v304_v36, %v102_v45  ;;  %v106_v61 = vmul.f32 %v278_v22, %v67_v50  ;;  %v174_v63 = vmax.f32 %v138_v48, 0.0  ;;  %v142_v0 = vadd.f32 %v304_v36, %v103_v49 }
  0x35   :  { %201 = vst [vmem:[%s565_s4 + $0x58] sm:$0xff] %v165_v26  ;;  %v107_v1 = vmul.f32 %v278_v22, %v68_v54  ;;  %v175_v3 = vmax.f32 %v139_v52, 0.0  ;;  %v143_v4 = vadd.f32 %v304_v36, %v104_v53  ;;  %v108_v5 = vmul.f32 %v278_v22, %v69_v58 }
  0x36   :  { %202 = vst [vmem:[%s565_s4 + $0x60] sm:$0xff] %v166_v30  ;;  %v176_v7 = vmax.f32 %v140_v56, 0.0  ;;  %v144_v8 = vadd.f32 %v304_v36, %v105_v57  ;;  %v109_v9 = vmul.f32 %v278_v22, %v70_v62  ;;  %v177_v11 = vmax.f32 %v141_v60, 0.0 }
  0x37   :  { %203 = vst [vmem:[%s565_s4 + $0x68] sm:$0xff] %v167_v34  ;;  %v145_v12 = vadd.f32 %v304_v36, %v106_v61  ;;  %v110_v13 = vmul.f32 %v278_v22, %v71_v2  ;;  %v178_v15 = vmax.f32 %v142_v0, 0.0  ;;  %v146_v16 = vadd.f32 %v304_v36, %v107_v1 }
  0x38   :  { %204 = vst [vmem:[%s565_s4 + $0x70] sm:$0xff] %v168_v39  ;;  %v111_v17 = vmul.f32 %v278_v22, %v72_v6  ;;  %v179_v19 = vmax.f32 %v143_v4, 0.0  ;;  %v147_v20 = vadd.f32 %v304_v36, %v108_v5  ;;  %v112_v21 = vmul.f32 %v278_v22, %v73_v10 }
  0x39   :  { %205 = vst [vmem:[%s565_s4 + $0x78] sm:$0xff] %v169_v43  ;;  %v180_v23 = vmax.f32 %v144_v8, 0.0  ;;  %v148_v24 = vadd.f32 %v304_v36, %v109_v9  ;;  %v113_v25 = vmul.f32 %v278_v22, %v74_v14  ;;  %v181_v26 = vmax.f32 %v145_v12, 0.0 }
  0x3a   :  { %206 = vst [vmem:[%s565_s4 + $0x80] sm:$0xff] %v170_v47  ;;  %v149_v27 = vadd.f32 %v304_v36, %v110_v13  ;;  %v114_v28 = vmul.f32 %v278_v22, %v75_v18  ;;  %v182_v29 = vmax.f32 %v146_v16, 0.0  ;;  %v150_v30 = vadd.f32 %v304_v36, %v111_v17 }
  0x3b   :  { %207 = vst [vmem:[%s565_s4 + $0x88] sm:$0xff] %v171_v51  ;;  %v183_v31 = vmax.f32 %v147_v20, 0.0  ;;  %v151_v32 = vadd.f32 %v304_v36, %v112_v21  ;;  %v184_v33 = vmax.f32 %v148_v24, 0.0  ;;  %v152_v22 = vadd.f32 %v304_v36, %v113_v25 }
  0x3c   :  { %208 = vst [vmem:[%s565_s4 + $0x90] sm:$0xff] %v172_v55  ;;  %v185_v34 = vmax.f32 %v149_v27, 0.0  ;;  %v153_v35 = vadd.f32 %v304_v36, %v114_v28  ;;  %v186_v37 = vmax.f32 %v150_v30, 0.0 }
  0x3d   :  { %209 = vst [vmem:[%s565_s4 + $0x98] sm:$0xff] %v173_v59  ;;  %v187_v38 = vmax.f32 %v151_v32, 0.0  ;;  %v188_v39 = vmax.f32 %v152_v22, 0.0 }
  0x3e   :  { %210 = vst [vmem:[%s565_s4 + $0xa0] sm:$0xff] %v174_v63  ;;  %v189_v36 = vmax.f32 %v153_v35, 0.0 }
  0x3f   :  { %211 = vst [vmem:[%s565_s4 + $0xa8] sm:$0xff] %v175_v3 }
  0x40   :  { %212 = vst [vmem:[%s565_s4 + $0xb0] sm:$0xff] %v176_v7 }
  0x41   :  { %213 = vst [vmem:[%s565_s4 + $0xb8] sm:$0xff] %v177_v11 }
  0x42   :  { %214 = vst [vmem:[%s565_s4 + $0xc0] sm:$0xff] %v178_v15 }
  0x43   :  { %215 = vst [vmem:[%s565_s4 + $0xc8] sm:$0xff] %v179_v19 }
  0x44   :  { %216 = vst [vmem:[%s565_s4 + $0xd0] sm:$0xff] %v180_v23 }
  0x45   :  { %217 = vst [vmem:[%s565_s4 + $0xd8] sm:$0xff] %v181_v26 }
  0x46   :  { %218 = vst [vmem:[%s565_s4 + $0xe0] sm:$0xff] %v182_v29 }
  0x47   :  { %219 = vst [vmem:[%s565_s4 + $0xe8] sm:$0xff] %v183_v31 }
  0x48   :  { %220 = vst [vmem:[%s565_s4 + $0xf0] sm:$0xff] %v184_v33 }
  0x49   :  { %221 = vst [vmem:[%s565_s4 + $0xf8] sm:$0xff] %v185_v34 }
  0x4a   :  { %222 = vst [vmem:[%s565_s4 + $0x100] sm:$0xff] %v186_v37 }
  0x4b   :  { %223 = vst [vmem:[%s565_s4 + $0x108] sm:$0xff] %v187_v38 }
  0x4c   :  { %224 = vst [vmem:[%s565_s4 + $0x110] sm:$0xff] %v188_v39 }
  0x4d   :  { %225 = vst [vmem:[%s565_s4 + $0x118] sm:$0xff] %v189_v36 }

// kernel: _lambda_.4
= control target key start
LH: loop header
LB: loop body
LE: loop exit
PB: predicated region body
PF: predicated region fallthrough
CT: control target
= control target key end

     0   :  { %vm220_vm0 = vcmask 1041408   ;;  %vm165_vm1 = vcmask 293888   ;;  %s982_s1 = inlined_call_operand.vmem [shape: bf16[36,128], index: 1, kind: input, shape index: {}]   ;;  %s983_s0 = inlined_call_operand.vmem [shape: bf16[288,36], index: 0, kind: input, shape index: {}]   ;;  %s984_s2 = inlined_call_operand.vmem [shape: f32[288,128], index: 2, kind: output, shape index: {0}]   ;;  %s985_s3 = inlined_call_operand.vmem [shape: f32[2,128], index: 3, kind: output, shape index: {1}]  }
   0x1   :  { %v59_v0 = vld [vmem:[%s982_s1 + $0x10] sm:$0x3]  ;;  %v608_v4 = vld [vmem:[%s982_s1 + $0x8] sm:$0xff]  ;;  %v607_v5 = vld [vmem:[%s982_s1] sm:$0xff] }
   0x2   :  { %v159_v1 = vunpack.c.l.b16 %v59_v0  ;;  %v589_v6 = vld [vmem:[%s983_s0] sm:$0xff]  ;;  %v594_v7 = vld [vmem:[%s983_s0 + $0x28] sm:$0xff]  ;;  %v599_v8 = vld [vmem:[%s983_s0 + $0x50] sm:$0xff] }
   0x3   :  { %v590_v9 = vld [vmem:[%s983_s0 + $0x8] sm:$0xff]  ;;  %v595_v10 = vld [vmem:[%s983_s0 + $0x30] sm:$0xff]  ;;  %v600_v11 = vld [vmem:[%s983_s0 + $0x58] sm:$0xff] }
   0x4   :  { %v162_v2 = vpack.c.b16 %v159_v1, %v159_v1  ;;  %v591_v12 = vld [vmem:[%s983_s0 + $0x10] sm:$0xff]  ;;  %v596_v13 = vld [vmem:[%s983_s0 + $0x38] sm:$0xff]  ;;  %v601_v14 = vld [vmem:[%s983_s0 + $0x60] sm:$0xff] }
   0x5   :  { %v604_v15 = vld [vmem:[%s983_s0 + $0x78] sm:$0xff]  ;;  %v597_v17 = vld [vmem:[%s983_s0 + $0x40] sm:$0xff]  ;;  %v602_v18 = vld [vmem:[%s983_s0 + $0x68] sm:$0xff] }
   0x6   :  { %v222_v3 = vsel %vm220_vm0, %v162_v2, 0  ;;  %v592_v16 = vld [vmem:[%s983_s0 + $0x18] sm:$0xff]  ;;  %v605_v19 = vld [vmem:[%s983_s0 + $0x80] sm:$0xff]  ;;  %v598_v21 = vld [vmem:[%s983_s0 + $0x48] sm:$0xff] }
   0x7   :  { %229 = vmatpush.bf16.msra.mxu0 %v222_v3  ;;  %609 = vmatpush.bf16.msra.mxu1 %v222_v3  ;;  %v593_v20 = vld [vmem:[%s983_s0 + $0x20] sm:$0xff]  ;;  %v603_v22 = vld [vmem:[%s983_s0 + $0x70] sm:$0xff]  ;;  %v606_v23 = vld [vmem:[%s983_s0 + $0x88] sm:$0xff] }
   0x8   :  { %610 = vmatpush.bf16.msra.mxu2 %v222_v3  ;;  %611 = vmatpush.bf16.msra.mxu3 %v222_v3 }
   0xb   :  { %230 = vmatpush.bf16.msra.mxu0 %v608_v4  ;;  %612 = vmatpush.bf16.msra.mxu1 %v608_v4 }
   0xc   :  { %613 = vmatpush.bf16.msra.mxu2 %v608_v4  ;;  %614 = vmatpush.bf16.msra.mxu3 %v608_v4 }
   0xf   :  { %231 = vmatpush.bf16.msra.mxu0 %v607_v5  ;;  %615 = vmatpush.bf16.msra.mxu1 %v607_v5 }
  0x10   :  { %616 = vmatpush.bf16.msra.mxu2 %v607_v5  ;;  %617 = vmatpush.bf16.msra.mxu3 %v607_v5 }
  0x12   :  { %571 = vmatmul.msk.bf16.vlgmr.msra.gmra.mxu0 %vm165_vm1, %v589_v6  ;;  %576 = vmatmul.msk.bf16.vlgmr.msra.gmra.mxu1 %vm165_vm1, %v594_v7 }
  0x13   :  { %581 = vmatmul.msk.bf16.vlgmr.msra.gmra.mxu2 %vm165_vm1, %v599_v8  ;;  %586 = vmatmul.msk.bf16.vlgmr.msra.gmra.mxu3 %vm165_vm1, %v604_v15 }
  0x22   :  { %572 = vmatmul.msk.bf16.gmra.mxu0 %vm165_vm1, %v590_v9  ;;  %577 = vmatmul.msk.bf16.gmra.mxu1 %vm165_vm1, %v595_v10 }
  0x23   :  { %582 = vmatmul.msk.bf16.gmra.mxu2 %vm165_vm1, %v600_v11  ;;  %587 = vmatmul.msk.bf16.gmra.mxu3 %vm165_vm1, %v605_v19 }
  0x32   :  { %573 = vmatmul.msk.bf16.gmra.mxu0 %vm165_vm1, %v591_v12  ;;  %578 = vmatmul.msk.bf16.gmra.mxu1 %vm165_vm1, %v596_v13 }
  0x33   :  { %583 = vmatmul.msk.bf16.gmra.mxu2 %vm165_vm1, %v601_v14  ;;  %588 = vmatmul.msk.bf16.gmra.mxu3 %vm165_vm1, %v606_v23 }
  0x42   :  { %574 = vmatmul.msk.bf16.gmra.mxu0 %vm165_vm1, %v592_v16  ;;  %579 = vmatmul.msk.bf16.gmra.mxu1 %vm165_vm1, %v597_v17 }
  0x43   :  { %584 = vmatmul.msk.bf16.gmra.mxu2 %vm165_vm1, %v602_v18 }
  0x52   :  { %575 = vmatmul.msk.bf16.gmra.mxu0 %vm165_vm1, %v593_v20  ;;  %580 = vmatmul.msk.bf16.gmra.mxu1 %vm165_vm1, %v598_v21 }
  0x53   :  { %585 = vmatmul.msk.bf16.gmra.mxu2 %vm165_vm1, %v603_v22 }
  0x8f   :  { %v233_v24 = vpop.f32.mrf.mxu0  ;;  %v721_v25 = vpop.f32.mrf.mxu1 }
  0x90   :  { %323 = vst [vmem:[%s984_s2] sm:$0xff] %v233_v24  ;;  %v404_v50 = vmul.f32 %v233_v24, %v233_v24  ;;  %v414_v20 = vmul.f32 %v721_v25, %v721_v25 }
  0x91   :  { %333 = vst [vmem:[%s984_s2 + $0x50] sm:$0xff] %v721_v25 }
  0x96   :  { %v730_v26 = vpop.f32.mrf.mxu2  ;;  %v805_v41 = vpop.f32.mrf.mxu3 }
  0x97   :  { %v235_v27 = vpop.f32.mrf.mxu0  ;;  %v732_v28 = vpop.f32.mrf.mxu1  ;;  %343 = vst [vmem:[%s984_s2 + $0xa0] sm:$0xff] %v730_v26 }
  0x98   :  { %324 = vst [vmem:[%s984_s2 + $0x8] sm:$0xff] %v235_v27  ;;  %v405_v46 = vmul.f32 %v235_v27, %v235_v27  ;;  %v360_v51 = vadd.f32 %v235_v27, %v233_v24  ;;  %v415_v24 = vmul.f32 %v732_v28, %v732_v28 }
  0x99   :  { %334 = vst [vmem:[%s984_s2 + $0x58] sm:$0xff] %v732_v28 }
  0x9a   :  { %353 = vst [vmem:[%s984_s2 + $0xf0] sm:$0xff] %v805_v41  ;;  %v440_v53 = vadd.f32 %v405_v46, %v404_v50 }
  0x9e   :  { %v745_v29 = vpop.f32.mrf.mxu2  ;;  %v826_v45 = vpop.f32.mrf.mxu3 }
  0x9f   :  { %v238_v30 = vpop.f32.mrf.mxu0  ;;  %v747_v31 = vpop.f32.mrf.mxu1  ;;  %344 = vst [vmem:[%s984_s2 + $0xa8] sm:$0xff] %v745_v29 }
  0xa0   :  { %325 = vst [vmem:[%s984_s2 + $0x10] sm:$0xff] %v238_v30  ;;  %v406_v52 = vmul.f32 %v238_v30, %v238_v30  ;;  %v361_v54 = vadd.f32 %v360_v51, %v238_v30 }
  0xa1   :  { %335 = vst [vmem:[%s984_s2 + $0x60] sm:$0xff] %v747_v31 }
  0xa2   :  { %354 = vst [vmem:[%s984_s2 + $0xf8] sm:$0xff] %v826_v45  ;;  %v441_v57 = vadd.f32 %v440_v53, %v406_v52 }
  0xa6   :  { %v760_v32 = vpop.f32.mrf.mxu2  ;;  %v847_v56 = vpop.f32.mrf.mxu3 }
  0xa7   :  { %v240_v33 = vpop.f32.mrf.mxu0  ;;  %v762_v34 = vpop.f32.mrf.mxu1  ;;  %345 = vst [vmem:[%s984_s2 + $0xb0] sm:$0xff] %v760_v32 }
  0xa8   :  { %326 = vst [vmem:[%s984_s2 + $0x18] sm:$0xff] %v240_v33  ;;  %v407_v55 = vmul.f32 %v240_v33, %v240_v33  ;;  %v362_v58 = vadd.f32 %v361_v54, %v240_v33  ;;  %v416_v33 = vmul.f32 %v747_v31, %v747_v31 }
  0xa9   :  { %336 = vst [vmem:[%s984_s2 + $0x68] sm:$0xff] %v762_v34 }
  0xaa   :  { %355 = vst [vmem:[%s984_s2 + $0x100] sm:$0xff] %v847_v56  ;;  %v442_v60 = vadd.f32 %v441_v57, %v407_v55 }
  0xae   :  { %v775_v35 = vpop.f32.mrf.mxu2  ;;  %v865_v8 = vpop.f32.mrf.mxu3 }
  0xaf   :  { %v243_v36 = vpop.f32.mrf.mxu0  ;;  %v777_v37 = vpop.f32.mrf.mxu1  ;;  %346 = vst [vmem:[%s984_s2 + $0xb8] sm:$0xff] %v775_v35 }
  0xb0   :  { %327 = vst [vmem:[%s984_s2 + $0x20] sm:$0xff] %v243_v36  ;;  %v408_v59 = vmul.f32 %v243_v36, %v243_v36  ;;  %v363_v61 = vadd.f32 %v362_v58, %v243_v36 }
  0xb1   :  { %337 = vst [vmem:[%s984_s2 + $0x70] sm:$0xff] %v777_v37 }
  0xb2   :  { %v443_v2 = vadd.f32 %v442_v60, %v408_v59  ;;  %356 = vst [vmem:[%s984_s2 + $0x108] sm:$0xff] %v865_v8 }
  0xb6   :  { %v790_v38 = vpop.f32.mrf.mxu2  ;;  %v886_v23 = vpop.f32.mrf.mxu3 }
  0xb7   :  { %v245_v39 = vpop.f32.mrf.mxu0  ;;  %v792_v40 = vpop.f32.mrf.mxu1  ;;  %347 = vst [vmem:[%s984_s2 + $0xc0] sm:$0xff] %v790_v38 }
  0xb8   :  { %328 = vst [vmem:[%s984_s2 + $0x28] sm:$0xff] %v245_v39  ;;  %v409_v62 = vmul.f32 %v245_v39, %v245_v39  ;;  %v364_v3 = vadd.f32 %v363_v61, %v245_v39 }
  0xb9   :  { %338 = vst [vmem:[%s984_s2 + $0x78] sm:$0xff] %v792_v40 }
  0xba   :  { %v444_v5 = vadd.f32 %v443_v2, %v409_v62  ;;  %357 = vst [vmem:[%s984_s2 + $0x110] sm:$0xff] %v886_v23 }
  0xbe   :  { %v811_v42 = vpop.f32.mrf.mxu2  ;;  %v907_v52 = vpop.f32.mrf.mxu3 }
  0xbf   :  { %v248_v43 = vpop.f32.mrf.mxu0  ;;  %v813_v44 = vpop.f32.mrf.mxu1  ;;  %348 = vst [vmem:[%s984_s2 + $0xc8] sm:$0xff] %v811_v42 }
  0xc0   :  { %329 = vst [vmem:[%s984_s2 + $0x30] sm:$0xff] %v248_v43  ;;  %v410_v4 = vmul.f32 %v248_v43, %v248_v43  ;;  %v365_v6 = vadd.f32 %v364_v3, %v248_v43  ;;  %v619_v3 = vmov 0.0  }
  0xc1   :  { %339 = vst [vmem:[%s984_s2 + $0x80] sm:$0xff] %v813_v44 }
  0xc2   :  { %v445_v9 = vadd.f32 %v444_v5, %v410_v4  ;;  %358 = vst [vmem:[%s984_s2 + $0x118] sm:$0xff] %v907_v52 }
  0xc3   :  { %18 = vst [vmem:[%s985_s3] sm:$0x3] %v619_v3 }
  0xc6   :  { %v832_v47 = vpop.f32.mrf.mxu2 }
  0xc7   :  { %v250_v48 = vpop.f32.mrf.mxu0  ;;  %v834_v49 = vpop.f32.mrf.mxu1  ;;  %349 = vst [vmem:[%s984_s2 + $0xd0] sm:$0xff] %v832_v47 }
  0xc8   :  { %330 = vst [vmem:[%s984_s2 + $0x38] sm:$0xff] %v250_v48  ;;  %v411_v7 = vmul.f32 %v250_v48, %v250_v48  ;;  %v366_v10 = vadd.f32 %v365_v6, %v250_v48  ;;  %v418_v48 = vmul.f32 %v777_v37, %v777_v37 }
  0xc9   :  { %340 = vst [vmem:[%s984_s2 + $0x88] sm:$0xff] %v834_v49 }
  0xca   :  { %v446_v12 = vadd.f32 %v445_v9, %v411_v7  ;;  %v426_v7 = vmul.f32 %v760_v32, %v760_v32 }
  0xce   :  { %v853_v63 = vpop.f32.mrf.mxu2 }
  0xcf   :  { %v253_v0 = vpop.f32.mrf.mxu0  ;;  %v278_v1 = vpop.f32.mrf.mxu1  ;;  %350 = vst [vmem:[%s984_s2 + $0xd8] sm:$0xff] %v853_v63 }
  0xd0   :  { %331 = vst [vmem:[%s984_s2 + $0x40] sm:$0xff] %v253_v0  ;;  %v412_v11 = vmul.f32 %v253_v0, %v253_v0  ;;  %v367_v13 = vadd.f32 %v366_v10, %v253_v0 }
  0xd1   :  { %341 = vst [vmem:[%s984_s2 + $0x90] sm:$0xff] %v278_v1 }
  0xd2   :  { %v447_v17 = vadd.f32 %v446_v12, %v412_v11  ;;  %v427_v11 = vmul.f32 %v775_v35, %v775_v35 }
  0xd6   :  { %v871_v14 = vpop.f32.mrf.mxu2 }
  0xd7   :  { %v255_v15 = vpop.f32.mrf.mxu0  ;;  %v280_v16 = vpop.f32.mrf.mxu1  ;;  %351 = vst [vmem:[%s984_s2 + $0xe0] sm:$0xff] %v871_v14 }
  0xd8   :  { %332 = vst [vmem:[%s984_s2 + $0x48] sm:$0xff] %v255_v15  ;;  %v368_v18 = vadd.f32 %v367_v13, %v255_v15  ;;  %v413_v19 = vmul.f32 %v255_v15, %v255_v15  ;;  %v423_v2 = vmul.f32 %v280_v16, %v280_v16 }
  0xd9   :  { %342 = vst [vmem:[%s984_s2 + $0x98] sm:$0xff] %v280_v16 }
  0xda   :  { %v369_v21 = vadd.f32 %v368_v18, %v721_v25  ;;  %v448_v22 = vadd.f32 %v447_v17, %v413_v19 }
  0xdc   :  { %v370_v27 = vadd.f32 %v369_v21, %v732_v28  ;;  %v449_v30 = vadd.f32 %v448_v22, %v414_v20  ;;  %v417_v28 = vmul.f32 %v762_v34, %v762_v34  ;;  %v431_v21 = vmul.f32 %v853_v63, %v853_v63 }
  0xde   :  { %v371_v36 = vadd.f32 %v370_v27, %v747_v31  ;;  %v450_v25 = vadd.f32 %v449_v30, %v415_v24  ;;  %v305_v39 = vpop.f32.mrf.mxu2  ;;  %v419_v31 = vmul.f32 %v792_v40, %v792_v40  ;;  %v432_v27 = vmul.f32 %v871_v14, %v871_v14 }
  0xdf   :  { %352 = vst [vmem:[%s984_s2 + $0xe8] sm:$0xff] %v305_v39 }
  0xe0   :  { %v372_v43 = vadd.f32 %v371_v36, %v762_v34  ;;  %v451_v46 = vadd.f32 %v450_v25, %v416_v33  ;;  %v420_v34 = vmul.f32 %v813_v44, %v813_v44  ;;  %v433_v33 = vmul.f32 %v305_v39, %v305_v39 }
  0xe1   :  { %v434_v36 = vmul.f32 %v805_v41, %v805_v41 }
  0xe2   :  { %v452_v50 = vadd.f32 %v451_v46, %v417_v28  ;;  %v373_v51 = vadd.f32 %v372_v43, %v777_v37  ;;  %v421_v37 = vmul.f32 %v834_v49, %v834_v49  ;;  %v435_v28 = vmul.f32 %v826_v45, %v826_v45 }
  0xe3   :  { %v436_v46 = vmul.f32 %v847_v56, %v847_v56 }
  0xe4   :  { %v374_v53 = vadd.f32 %v373_v51, %v792_v40  ;;  %v453_v54 = vadd.f32 %v452_v50, %v418_v48  ;;  %v422_v40 = vmul.f32 %v278_v1, %v278_v1 }
  0xe6   :  { %v375_v55 = vadd.f32 %v374_v53, %v813_v44  ;;  %v454_v57 = vadd.f32 %v453_v54, %v419_v31  ;;  %v424_v44 = vmul.f32 %v730_v26, %v730_v26  ;;  %v438_v31 = vmul.f32 %v886_v23, %v886_v23 }
  0xe8   :  { %v376_v58 = vadd.f32 %v375_v55, %v834_v49  ;;  %v455_v59 = vadd.f32 %v454_v57, %v420_v34  ;;  %v425_v49 = vmul.f32 %v745_v29, %v745_v29  ;;  %v439_v34 = vmul.f32 %v907_v52, %v907_v52 }
  0xea   :  { %v377_v60 = vadd.f32 %v376_v58, %v278_v1  ;;  %v456_v61 = vadd.f32 %v455_v59, %v421_v37 }
  0xec   :  { %v457_v62 = vadd.f32 %v456_v61, %v422_v40  ;;  %v378_v0 = vadd.f32 %v377_v60, %v280_v16 }
  0xee   :  { %v379_v4 = vadd.f32 %v378_v0, %v730_v26  ;;  %v458_v5 = vadd.f32 %v457_v62, %v423_v2  ;;  %v428_v26 = vmul.f32 %v790_v38, %v790_v38 }
  0xf0   :  { %v380_v1 = vadd.f32 %v379_v4, %v745_v29  ;;  %v459_v6 = vadd.f32 %v458_v5, %v424_v44  ;;  %v429_v29 = vmul.f32 %v811_v42, %v811_v42 }
  0xf2   :  { %v381_v9 = vadd.f32 %v380_v1, %v760_v32  ;;  %v460_v10 = vadd.f32 %v459_v6, %v425_v49  ;;  %v430_v32 = vmul.f32 %v832_v47, %v832_v47 }
  0xf4   :  { %v382_v12 = vadd.f32 %v381_v9, %v775_v35  ;;  %v461_v13 = vadd.f32 %v460_v10, %v426_v7 }
  0xf6   :  { %v462_v15 = vadd.f32 %v461_v13, %v427_v11  ;;  %v383_v16 = vadd.f32 %v382_v12, %v790_v38 }
  0xf8   :  { %v384_v17 = vadd.f32 %v383_v16, %v811_v42  ;;  %v463_v18 = vadd.f32 %v462_v15, %v428_v26 }
  0xfa   :  { %v385_v19 = vadd.f32 %v384_v17, %v832_v47  ;;  %v464_v20 = vadd.f32 %v463_v18, %v429_v29 }
  0xfc   :  { %v386_v35 = vadd.f32 %v385_v19, %v853_v63  ;;  %v465_v22 = vadd.f32 %v464_v20, %v430_v32 }
  0xfe   :  { %v466_v24 = vadd.f32 %v465_v22, %v431_v21  ;;  %v387_v38 = vadd.f32 %v386_v35, %v871_v14 }
 0x100   :  { %v467_v42 = vadd.f32 %v466_v24, %v432_v27  ;;  %v388_v30 = vadd.f32 %v387_v38, %v305_v39  ;;  %v437_v39 = vmul.f32 %v865_v8, %v865_v8 }
 0x102   :  { %v389_v47 = vadd.f32 %v388_v30, %v805_v41  ;;  %v468_v25 = vadd.f32 %v467_v42, %v433_v33 }
 0x104   :  { %v390_v63 = vadd.f32 %v389_v47, %v826_v45  ;;  %v469_v43 = vadd.f32 %v468_v25, %v434_v36 }
 0x106   :  { %v470_v48 = vadd.f32 %v469_v43, %v435_v28  ;;  %v391_v14 = vadd.f32 %v390_v63, %v847_v56 }
 0x108   :  { %v392_v50 = vadd.f32 %v391_v14, %v865_v8  ;;  %v471_v51 = vadd.f32 %v470_v48, %v436_v46 }
 0x10a   :  { %v393_v41 = vadd.f32 %v392_v50, %v886_v23  ;;  %v472_v53 = vadd.f32 %v471_v51, %v437_v39  ;;  %v359_v23 = vld [vmem:[%s985_s3] sm:$0x1] }
 0x10c   :  { %v473_v45 = vadd.f32 %v472_v53, %v438_v31  ;;  %v394_v54 = vadd.f32 %v393_v41, %v907_v52  ;;  %v403_v52 = vld [vmem:[%s985_s3 + $0x1] sm:$0x1] }
 0x10e   :  { %v395_v55 = vrot.slane %v394_v54, 4  ;;  %v474_v56 = vadd.f32 %v473_v45, %v439_v34 }
 0x110   :  { %v396_v57 = vadd.f32 %v395_v55, %v394_v54  ;;  %v475_v37 = vrot.slane %v474_v56, 4 }
 0x112   :  { %v397_v58 = vrot.slane %v396_v57, 2  ;;  %v476_v59 = vadd.f32 %v475_v37, %v474_v56 }
 0x114   :  { %v398_v8 = vadd.f32 %v397_v58, %v396_v57  ;;  %v477_v60 = vrot.slane %v476_v59, 2 }
 0x116   :  { %v399_v40 = vrot.slane %v398_v8, 1  ;;  %v478_v61 = vadd.f32 %v477_v60, %v476_v59 }
 0x118   :  { %v400_v62 = vadd.f32 %v399_v40, %v398_v8  ;;  %v479_v0 = vrot.slane %v478_v61, 1 }
 0x11a   :  { %v401_v2 = vadd.f32 %v400_v62, %v359_v23  ;;  %v480_v3 = vadd.f32 %v479_v0, %v478_v61 }
 0x11c   :  { %402 = vst [vmem:[%s985_s3] sm:$0x1] %v401_v2  ;;  %v481_v44 = vadd.f32 %v480_v3, %v403_v52 }
 0x11e   :  { %482 = vst [vmem:[%s985_s3 + $0x1] sm:$0x1] %v481_v44 }

// kernel: _lambda_.7
= control target key start
LH: loop header
LB: loop body
LE: loop exit
PB: predicated region body
PF: predicated region fallthrough
CT: control target
= control target key end

     0   :  { %s327_s1 = inlined_call_operand.vmem [shape: f32[2,128], index: 1, kind: input, shape index: {}]   ;;  %s328_s2 = inlined_call_operand.vmem [shape: f32[1,128], index: 2, kind: input, shape index: {}]   ;;  %s329_s3 = inlined_call_operand.vmem [shape: f32[1,128], index: 3, kind: input, shape index: {}]   ;;  %s330_s0 = inlined_call_operand.vmem [shape: f32[144,128], index: 0, kind: input, shape index: {}]   ;;  %s331_s4 = inlined_call_operand.vmem [shape: f32[144,128], index: 4, kind: output, shape index: {}]  }
   0x1   :  { %v17_v0 = vld [vmem:[%s327_s1] sm:$0x1]  ;;  %v19_v1 = vld [vmem:[%s327_s1 + $0x1] sm:$0x1]  ;;  %v41_v19 = vld [vmem:[%s330_s0 + $0x8] sm:$0xff] }
   0x2   :  { %v18_v2 = vmul.f32 0.0069444445, %v17_v0  ;;  %v20_v3 = vmul.f32 0.0069444445, %v19_v1  ;;  %v24_v13 = vld [vmem:[%s328_s2] sm:$0x1] }
   0x3   :  { %v37_v17 = vld [vmem:[%s329_s3] sm:$0x1]  ;;  %v42_v20 = vld [vmem:[%s330_s0 + $0x10] sm:$0xff]  ;;  %v43_v23 = vld [vmem:[%s330_s0 + $0x18] sm:$0xff] }
   0x4   :  { %v21_v4 = vmul.f32 %v18_v2, %v18_v2  ;;  %v40_v18 = vld [vmem:[%s330_s0] sm:$0xff]  ;;  %v45_v25 = vld [vmem:[%s330_s0 + $0x28] sm:$0xff]  ;;  %v46_v26 = vld [vmem:[%s330_s0 + $0x30] sm:$0xff] }
   0x5   :  { %v44_v24 = vld [vmem:[%s330_s0 + $0x20] sm:$0xff]  ;;  %v47_v31 = vld [vmem:[%s330_s0 + $0x38] sm:$0xff]  ;;  %v49_v38 = vld [vmem:[%s330_s0 + $0x48] sm:$0xff] }
   0x6   :  { %v22_v5 = vsub.f32 %v20_v3, %v21_v4  ;;  %v48_v32 = vld [vmem:[%s330_s0 + $0x40] sm:$0xff]  ;;  %v50_v39 = vld [vmem:[%s330_s0 + $0x50] sm:$0xff]  ;;  %v51_v46 = vld [vmem:[%s330_s0 + $0x58] sm:$0xff] }
   0x7   :  { %v52_v51 = vld [vmem:[%s330_s0 + $0x60] sm:$0xff]  ;;  %v53_v56 = vld [vmem:[%s330_s0 + $0x68] sm:$0xff]  ;;  %v54_v60 = vld [vmem:[%s330_s0 + $0x70] sm:$0xff] }
   0x8   :  { %v23_v6 = vmax.f32 %v22_v5, 0.0  ;;  %v55_v0 = vld [vmem:[%s330_s0 + $0x78] sm:$0xff]  ;;  %v56_v4 = vld [vmem:[%s330_s0 + $0x80] sm:$0xff] }
   0xa   :  { %v25_v7 = vadd.f32 1e-05, %v23_v6 }
   0xc   :  { %140 = vrsqrt.f32 %v25_v7  ;;  %vm32_vm0 = vweird.f32 %v25_v7 }
  0x12   :  { %v141_v8 = vpop.eup %140 }
  0x13   :  { %v27_v9 = vmul.f32 %v141_v8, %v25_v7  ;;  %vm33_vm1 = vweird.f32 %v141_v8 }
  0x14   :  { %vm34_vm2 = vmor %vm32_vm0, %vm33_vm1 }
  0x15   :  { %v28_v10 = vmul.f32 %v141_v8, %v27_v9 }
  0x17   :  { %v29_v11 = vmul.f32 0.5, %v28_v10 }
  0x19   :  { %v30_v12 = vsub.f32 1.5, %v29_v11 }
  0x1b   :  { %v31_v14 = vmul.f32 %v141_v8, %v30_v12 }
  0x1d   :  { %v35_v15 = vsel %vm34_vm2, %v141_v8, %v31_v14  ;;  %v57_v8 = vld [vmem:[%s330_s0 + $0x88] sm:$0xff] }
  0x1e   :  { %v36_v16 = vmul.f32 %v35_v15, %v24_v13 }
  0x20   :  { %v38_v21 = vmul.f32 %v36_v16, %v18_v2  ;;  %v188_v22 = vperm.slane %v36_v16, 0 }
  0x22   :  { %v39_v27 = vsub.f32 %v37_v17, %v38_v21  ;;  %v61_v28 = vmul.f32 %v188_v22, %v40_v18  ;;  %v62_v29 = vmul.f32 %v188_v22, %v41_v19  ;;  %v63_v30 = vmul.f32 %v188_v22, %v42_v20 }
  0x23   :  { %v64_v33 = vmul.f32 %v188_v22, %v43_v23  ;;  %v65_v34 = vmul.f32 %v188_v22, %v44_v24  ;;  %v66_v35 = vmul.f32 %v188_v22, %v45_v25  ;;  %v67_v37 = vmul.f32 %v188_v22, %v46_v26 }
  0x24   :  { %v214_v36 = vperm.slane %v39_v27, 0  ;;  %v68_v40 = vmul.f32 %v188_v22, %v47_v31  ;;  %v69_v41 = vmul.f32 %v188_v22, %v48_v32  ;;  %v70_v49 = vmul.f32 %v188_v22, %v49_v38 }
  0x25   :  { %v71_v50 = vmul.f32 %v188_v22, %v50_v39  ;;  %v72_v59 = vmul.f32 %v188_v22, %v51_v46  ;;  %v73_v63 = vmul.f32 %v188_v22, %v52_v51  ;;  %v74_v3 = vmul.f32 %v188_v22, %v53_v56 }
  0x26   :  { %v82_v42 = vadd.f32 %v214_v36, %v61_v28  ;;  %v83_v43 = vadd.f32 %v214_v36, %v62_v29  ;;  %v84_v44 = vadd.f32 %v214_v36, %v63_v30  ;;  %v85_v45 = vadd.f32 %v214_v36, %v64_v33 }
  0x27   :  { %v86_v47 = vadd.f32 %v214_v36, %v65_v34  ;;  %v87_v48 = vadd.f32 %v214_v36, %v66_v35  ;;  %v88_v55 = vadd.f32 %v214_v36, %v67_v37  ;;  %v89_v58 = vadd.f32 %v214_v36, %v68_v40 }
  0x28   :  { %v100_v52 = vmax.f32 %v82_v42, 0.0  ;;  %v101_v53 = vmax.f32 %v83_v43, 0.0  ;;  %v102_v54 = vmax.f32 %v84_v44, 0.0  ;;  %v103_v57 = vmax.f32 %v85_v45, 0.0 }
  0x29   :  { %v104_v61 = vmax.f32 %v86_v47, 0.0  ;;  %v90_v62 = vadd.f32 %v214_v36, %v69_v41  ;;  %v105_v1 = vmax.f32 %v87_v48, 0.0  ;;  %v91_v2 = vadd.f32 %v214_v36, %v70_v49 }
  0x2a   :  { %118 = vst [vmem:[%s331_s4] sm:$0xff] %v100_v52  ;;  %v106_v5 = vmax.f32 %v88_v55, 0.0  ;;  %v92_v6 = vadd.f32 %v214_v36, %v71_v50  ;;  %v75_v7 = vmul.f32 %v188_v22, %v54_v60  ;;  %v107_v9 = vmax.f32 %v89_v58, 0.0 }
  0x2b   :  { %119 = vst [vmem:[%s331_s4 + $0x8] sm:$0xff] %v101_v53  ;;  %v93_v10 = vadd.f32 %v214_v36, %v72_v59  ;;  %v76_v11 = vmul.f32 %v188_v22, %v55_v0  ;;  %v108_v12 = vmax.f32 %v90_v62, 0.0  ;;  %v94_v13 = vadd.f32 %v214_v36, %v73_v63 }
  0x2c   :  { %120 = vst [vmem:[%s331_s4 + $0x10] sm:$0xff] %v102_v54  ;;  %v77_v14 = vmul.f32 %v188_v22, %v56_v4  ;;  %v109_v15 = vmax.f32 %v91_v2, 0.0  ;;  %v95_v16 = vadd.f32 %v214_v36, %v74_v3  ;;  %v78_v17 = vmul.f32 %v188_v22, %v57_v8 }
  0x2d   :  { %121 = vst [vmem:[%s331_s4 + $0x18] sm:$0xff] %v103_v57  ;;  %v110_v18 = vmax.f32 %v92_v6, 0.0  ;;  %v96_v19 = vadd.f32 %v214_v36, %v75_v7  ;;  %v111_v20 = vmax.f32 %v93_v10, 0.0  ;;  %v97_v21 = vadd.f32 %v214_v36, %v76_v11 }
  0x2e   :  { %122 = vst [vmem:[%s331_s4 + $0x20] sm:$0xff] %v104_v61  ;;  %v112_v23 = vmax.f32 %v94_v13, 0.0  ;;  %v98_v22 = vadd.f32 %v214_v36, %v77_v14  ;;  %v113_v24 = vmax.f32 %v95_v16, 0.0  ;;  %v99_v25 = vadd.f32 %v214_v36, %v78_v17 }
  0x2f   :  { %123 = vst [vmem:[%s331_s4 + $0x28] sm:$0xff] %v105_v1  ;;  %v114_v26 = vmax.f32 %v96_v19, 0.0  ;;  %v115_v27 = vmax.f32 %v97_v21, 0.0 }
  0x30   :  { %124 = vst [vmem:[%s331_s4 + $0x30] sm:$0xff] %v106_v5  ;;  %v116_v28 = vmax.f32 %v98_v22, 0.0  ;;  %v117_v29 = vmax.f32 %v99_v25, 0.0 }
  0x31   :  { %125 = vst [vmem:[%s331_s4 + $0x38] sm:$0xff] %v107_v9 }
  0x32   :  { %126 = vst [vmem:[%s331_s4 + $0x40] sm:$0xff] %v108_v12 }
  0x33   :  { %127 = vst [vmem:[%s331_s4 + $0x48] sm:$0xff] %v109_v15 }
  0x34   :  { %128 = vst [vmem:[%s331_s4 + $0x50] sm:$0xff] %v110_v18 }
  0x35   :  { %129 = vst [vmem:[%s331_s4 + $0x58] sm:$0xff] %v111_v20 }
  0x36   :  { %130 = vst [vmem:[%s331_s4 + $0x60] sm:$0xff] %v112_v23 }
  0x37   :  { %131 = vst [vmem:[%s331_s4 + $0x68] sm:$0xff] %v113_v24 }
  0x38   :  { %132 = vst [vmem:[%s331_s4 + $0x70] sm:$0xff] %v114_v26 }
  0x39   :  { %133 = vst [vmem:[%s331_s4 + $0x78] sm:$0xff] %v115_v27 }
  0x3a   :  { %134 = vst [vmem:[%s331_s4 + $0x80] sm:$0xff] %v116_v28 }
  0x3b   :  { %135 = vst [vmem:[%s331_s4 + $0x88] sm:$0xff] %v117_v29 }

// kernel: _lambda_.6
= control target key start
LH: loop header
LB: loop body
LE: loop exit
PB: predicated region body
PF: predicated region fallthrough
CT: control target
= control target key end

     0   :  { %vm122_vm0 = vcmask 1043456   ;;  %vm94_vm1 = vcmask 195584   ;;  %v342_v39 = vmov 0.0   ;;  %s486_s1 = inlined_call_operand.vmem [shape: bf16[24,128], index: 1, kind: input, shape index: {}]   ;;  %s487_s0 = inlined_call_operand.vmem [shape: bf16[144,24], index: 0, kind: input, shape index: {}]   ;;  %s488_s2 = inlined_call_operand.vmem [shape: f32[144,128], index: 2, kind: output, shape index: {0}]   ;;  %s489_s3 = inlined_call_operand.vmem [shape: f32[2,128], index: 3, kind: output, shape index: {1}]  }
   0x1   :  { %v39_v0 = vld [vmem:[%s486_s1 + $0x8] sm:$0xf]  ;;  %v334_v4 = vld [vmem:[%s486_s1] sm:$0xff]  ;;  %v327_v6 = vld [vmem:[%s487_s0 + $0x10] sm:$0xff]  ;;  %18 = vst [vmem:[%s489_s3] sm:$0x3] %v342_v39 }
   0x2   :  { %v90_v1 = vunpack.c.l.b16 %v39_v0  ;;  %v325_v5 = vld [vmem:[%s487_s0] sm:$0xff]  ;;  %v331_v7 = vld [vmem:[%s487_s0 + $0x30] sm:$0xff]  ;;  %v330_v8 = vld [vmem:[%s487_s0 + $0x28] sm:$0xff] }
   0x3   :  { %v326_v9 = vld [vmem:[%s487_s0 + $0x8] sm:$0xff]  ;;  %v328_v10 = vld [vmem:[%s487_s0 + $0x18] sm:$0xff]  ;;  %v329_v12 = vld [vmem:[%s487_s0 + $0x20] sm:$0xff] }
   0x4   :  { %v92_v2 = vpack.c.b16 %v90_v1, %v90_v1  ;;  %v332_v11 = vld [vmem:[%s487_s0 + $0x38] sm:$0xff]  ;;  %v333_v13 = vld [vmem:[%s487_s0 + $0x40] sm:$0xff] }
   0x6   :  { %v124_v3 = vsel %vm122_vm0, %v92_v2, 0 }
   0x7   :  { %132 = vmatpush.bf16.msra.mxu0 %v124_v3  ;;  %335 = vmatpush.bf16.msra.mxu1 %v124_v3 }
   0x8   :  { %337 = vmatpush.bf16.msra.mxu3 %v124_v3  ;;  %336 = vmatpush.bf16.msra.mxu2 %v124_v3 }
   0xb   :  { %133 = vmatpush.bf16.msra.mxu0 %v334_v4  ;;  %338 = vmatpush.bf16.msra.mxu1 %v334_v4 }
   0xc   :  { %340 = vmatpush.bf16.msra.mxu3 %v334_v4  ;;  %339 = vmatpush.bf16.msra.mxu2 %v334_v4 }
   0xe   :  { %316 = vmatmul.msk.bf16.vlgmr.msra.gmra.mxu0 %vm94_vm1, %v325_v5  ;;  %318 = vmatmul.msk.bf16.vlgmr.msra.gmra.mxu1 %vm94_vm1, %v327_v6 }
   0xf   :  { %322 = vmatmul.msk.bf16.vlgmr.msra.gmra.mxu3 %vm94_vm1, %v331_v7  ;;  %321 = vmatmul.msk.bf16.vlgmr.msra.gmra.mxu2 %vm94_vm1, %v330_v8 }
  0x1e   :  { %317 = vmatmul.msk.bf16.gmra.mxu0 %vm94_vm1, %v326_v9  ;;  %319 = vmatmul.msk.bf16.gmra.mxu1 %vm94_vm1, %v328_v10 }
  0x1f   :  { %323 = vmatmul.msk.bf16.gmra.mxu3 %vm94_vm1, %v332_v11 }
  0x2e   :  { %320 = vmatmul.msk.bf16.gmra.mxu1 %vm94_vm1, %v329_v12 }
  0x2f   :  { %324 = vmatmul.msk.bf16.gmra.mxu3 %vm94_vm1, %v333_v13 }
  0x8b   :  { %v135_v14 = vpop.f32.mrf.mxu0  ;;  %v145_v15 = vpop.f32.mrf.mxu1 }
  0x8c   :  { %180 = vst [vmem:[%s488_s2] sm:$0xff] %v135_v14  ;;  %v225_v25 = vmul.f32 %v135_v14, %v135_v14  ;;  %v229_v36 = vmul.f32 %v145_v15, %v145_v15 }
  0x8d   :  { %184 = vst [vmem:[%s488_s2 + $0x20] sm:$0xff] %v145_v15 }
  0x92   :  { %v411_v16 = vpop.f32.mrf.mxu3  ;;  %v160_v17 = vpop.f32.mrf.mxu2 }
  0x93   :  { %v137_v18 = vpop.f32.mrf.mxu0  ;;  %v147_v19 = vpop.f32.mrf.mxu1  ;;  %192 = vst [vmem:[%s488_s2 + $0x60] sm:$0xff] %v411_v16  ;;  %v235_v59 = vmul.f32 %v160_v17, %v160_v17  ;;  %v237_v1 = vmul.f32 %v411_v16, %v411_v16 }
  0x94   :  { %181 = vst [vmem:[%s488_s2 + $0x8] sm:$0xff] %v137_v18  ;;  %v226_v24 = vmul.f32 %v137_v18, %v137_v18  ;;  %v199_v26 = vadd.f32 %v137_v18, %v135_v14  ;;  %v230_v40 = vmul.f32 %v147_v19, %v147_v19 }
  0x95   :  { %185 = vst [vmem:[%s488_s2 + $0x28] sm:$0xff] %v147_v19 }
  0x96   :  { %190 = vst [vmem:[%s488_s2 + $0x50] sm:$0xff] %v160_v17  ;;  %v243_v28 = vadd.f32 %v226_v24, %v225_v25 }
  0x9a   :  { %v426_v20 = vpop.f32.mrf.mxu3  ;;  %v162_v21 = vpop.f32.mrf.mxu2 }
  0x9b   :  { %v140_v22 = vpop.f32.mrf.mxu0  ;;  %v150_v23 = vpop.f32.mrf.mxu1  ;;  %193 = vst [vmem:[%s488_s2 + $0x68] sm:$0xff] %v426_v20  ;;  %v236_v62 = vmul.f32 %v162_v21, %v162_v21  ;;  %v238_v5 = vmul.f32 %v426_v20, %v426_v20 }
  0x9c   :  { %182 = vst [vmem:[%s488_s2 + $0x10] sm:$0xff] %v140_v22  ;;  %v227_v27 = vmul.f32 %v140_v22, %v140_v22  ;;  %v200_v29 = vadd.f32 %v199_v26, %v140_v22  ;;  %v231_v43 = vmul.f32 %v150_v23, %v150_v23 }
  0x9d   :  { %186 = vst [vmem:[%s488_s2 + $0x30] sm:$0xff] %v150_v23 }
  0x9e   :  { %191 = vst [vmem:[%s488_s2 + $0x58] sm:$0xff] %v162_v21  ;;  %v244_v33 = vadd.f32 %v243_v28, %v227_v27 }
  0xa2   :  { %v170_v30 = vpop.f32.mrf.mxu3 }
  0xa3   :  { %v142_v31 = vpop.f32.mrf.mxu0  ;;  %v152_v32 = vpop.f32.mrf.mxu1  ;;  %194 = vst [vmem:[%s488_s2 + $0x70] sm:$0xff] %v170_v30  ;;  %v239_v8 = vmul.f32 %v170_v30, %v170_v30 }
  0xa4   :  { %183 = vst [vmem:[%s488_s2 + $0x18] sm:$0xff] %v142_v31  ;;  %v201_v34 = vadd.f32 %v200_v29, %v142_v31  ;;  %v228_v35 = vmul.f32 %v142_v31, %v142_v31  ;;  %v232_v50 = vmul.f32 %v152_v32, %v152_v32 }
  0xa5   :  { %187 = vst [vmem:[%s488_s2 + $0x38] sm:$0xff] %v152_v32 }
  0xa6   :  { %v202_v37 = vadd.f32 %v201_v34, %v145_v15  ;;  %v245_v38 = vadd.f32 %v244_v33, %v228_v35  ;;  %v224_v33 = vld [vmem:[%s489_s3 + $0x1] sm:$0x1] }
  0xa8   :  { %v203_v41 = vadd.f32 %v202_v37, %v147_v19  ;;  %v246_v42 = vadd.f32 %v245_v38, %v229_v36 }
  0xaa   :  { %v247_v44 = vadd.f32 %v246_v42, %v230_v40  ;;  %v204_v45 = vadd.f32 %v203_v41, %v150_v23  ;;  %v172_v46 = vpop.f32.mrf.mxu3 }
  0xab   :  { %v155_v47 = vpop.f32.mrf.mxu1  ;;  %195 = vst [vmem:[%s488_s2 + $0x78] sm:$0xff] %v172_v46  ;;  %v240_v11 = vmul.f32 %v172_v46, %v172_v46 }
  0xac   :  { %v248_v48 = vadd.f32 %v247_v44, %v231_v43  ;;  %188 = vst [vmem:[%s488_s2 + $0x40] sm:$0xff] %v155_v47  ;;  %v205_v49 = vadd.f32 %v204_v45, %v152_v32  ;;  %v233_v53 = vmul.f32 %v155_v47, %v155_v47 }
  0xae   :  { %v249_v51 = vadd.f32 %v248_v48, %v232_v50  ;;  %v206_v52 = vadd.f32 %v205_v49, %v155_v47 }
  0xb0   :  { %v250_v56 = vadd.f32 %v249_v51, %v233_v53 }
  0xb2   :  { %v175_v54 = vpop.f32.mrf.mxu3 }
  0xb3   :  { %v157_v55 = vpop.f32.mrf.mxu1  ;;  %196 = vst [vmem:[%s488_s2 + $0x80] sm:$0xff] %v175_v54  ;;  %v241_v15 = vmul.f32 %v175_v54, %v175_v54 }
  0xb4   :  { %189 = vst [vmem:[%s488_s2 + $0x48] sm:$0xff] %v157_v55  ;;  %v207_v57 = vadd.f32 %v206_v52, %v157_v55  ;;  %v234_v58 = vmul.f32 %v157_v55, %v157_v55 }
  0xb6   :  { %v208_v60 = vadd.f32 %v207_v57, %v160_v17  ;;  %v251_v61 = vadd.f32 %v250_v56, %v234_v58 }
  0xb8   :  { %v209_v63 = vadd.f32 %v208_v60, %v162_v21  ;;  %v252_v0 = vadd.f32 %v251_v61, %v235_v59 }
  0xba   :  { %v210_v2 = vadd.f32 %v209_v63, %v411_v16  ;;  %v253_v3 = vadd.f32 %v252_v0, %v236_v62  ;;  %v177_v4 = vpop.f32.mrf.mxu3 }
  0xbb   :  { %197 = vst [vmem:[%s488_s2 + $0x88] sm:$0xff] %v177_v4  ;;  %v242_v19 = vmul.f32 %v177_v4, %v177_v4 }
  0xbc   :  { %v254_v6 = vadd.f32 %v253_v3, %v237_v1  ;;  %v211_v7 = vadd.f32 %v210_v2, %v426_v20 }
  0xbe   :  { %v212_v9 = vadd.f32 %v211_v7, %v170_v30  ;;  %v255_v10 = vadd.f32 %v254_v6, %v238_v5  ;;  %v198_v30 = vld [vmem:[%s489_s3] sm:$0x1] }
  0xc0   :  { %v213_v12 = vadd.f32 %v212_v9, %v172_v46  ;;  %v256_v13 = vadd.f32 %v255_v10, %v239_v8 }
  0xc2   :  { %v214_v14 = vadd.f32 %v213_v12, %v175_v54  ;;  %v257_v16 = vadd.f32 %v256_v13, %v240_v11 }
  0xc4   :  { %v258_v17 = vadd.f32 %v257_v16, %v241_v15  ;;  %v215_v18 = vadd.f32 %v214_v14, %v177_v4 }
  0xc6   :  { %v216_v21 = vrot.slane %v215_v18, 4  ;;  %v259_v22 = vadd.f32 %v258_v17, %v242_v19 }
  0xc8   :  { %v217_v23 = vadd.f32 %v216_v21, %v215_v18  ;;  %v260_v24 = vrot.slane %v259_v22, 4 }
  0xca   :  { %v218_v25 = vrot.slane %v217_v23, 2  ;;  %v261_v26 = vadd.f32 %v260_v24, %v259_v22 }
  0xcc   :  { %v219_v27 = vadd.f32 %v218_v25, %v217_v23  ;;  %v262_v20 = vrot.slane %v261_v26, 2 }
  0xce   :  { %v220_v28 = vrot.slane %v219_v27, 1  ;;  %v263_v29 = vadd.f32 %v262_v20, %v261_v26 }
  0xd0   :  { %v221_v31 = vadd.f32 %v220_v28, %v219_v27  ;;  %v264_v32 = vrot.slane %v263_v29, 1 }
  0xd2   :  { %v222_v34 = vadd.f32 %v221_v31, %v198_v30  ;;  %v265_v35 = vadd.f32 %v264_v32, %v263_v29 }
  0xd4   :  { %223 = vst [vmem:[%s489_s3] sm:$0x1] %v222_v34  ;;  %v266_v36 = vadd.f32 %v265_v35, %v224_v33 }
  0xd6   :  { %267 = vst [vmem:[%s489_s3 + $0x1] sm:$0x1] %v266_v36 }

</bundles_post_ra>
